<compile_context>
chip_gen: v6e
topology: v6e:2x2x1
jax: 0.10.0
libtpu: 0.0.40
codegen_flags: <defaults>
</compile_context>

<pallas_src>
import math

import jax
import jax.numpy as jnp
from jax.experimental import pallas as pl
from jax.experimental.pallas import tpu as pltpu


BATCH_PAD = 8          # sublane-dense batch padding (f32 tile is 8 sublanes)
LANES = 128            # vreg lane width == packed gate width (4 * hidden)


def _weight_blob_layout(num_layers, hidden, in_pad):
    """Row offsets of each weight slab inside the packed bf16 weight blob."""
    offs = []
    r = 0
    for layer in range(num_layers):
        k_in = in_pad if layer == 0 else hidden
        offs.append((r, k_in)); r += k_in          # W_ih  (k_in, 4H)
        offs.append((r, hidden)); r += hidden      # W_hh  (H, 4H)
    offs.append((r, hidden)); r += hidden          # W1    (H, 128)   fc1
    offs.append((r, LANES)); r += LANES            # W234  (128, 128) folded fc2@fc3@fc4
    return offs, r


def make_actor_kernel(num_layers, seq_len, hidden, num_actions, in_pad):
    T, Bp, H, A = seq_len, BATCH_PAD, hidden, num_actions
    offs, _ = _weight_blob_layout(num_layers, hidden, in_pad)

    def kernel(x_ref, w_ref, f_ref, out_ref, hbuf_ref):
        # x_ref   : (T*Bp, in_pad) bf16  time-major, batch/feature zero-padded
        # w_ref   : (WROWS, 128)   bf16  packed weights (_weight_blob_layout order)
        # f_ref   : (8*L + 16 + Bp, 128) f32  packed LSTM biases, b1, b234, noise
        # out_ref : (Bp, 2A)       f32   [action | log_prob]
        # hbuf_ref: (T*Bp, H)      f32   inter-layer hidden-state scratch
        #
        # TODO(synk): nn.LSTM(dropout=0.2) inter-layer dropout (training mode) is
        #             not reproduced; inference semantics are used.

        layer_in = x_ref[...]                                   # (T*Bp, K) bf16
        feat = None
        widx = 0
        for layer in range(num_layers):
            wih_r, k_in = offs[widx]; widx += 1
            whh_r, _ = offs[widx]; widx += 1
            bias = f_ref[8 * layer:8 * layer + 1, :]            # (1, 4H) f32, gates [i,f,g,o]

            # Hoisted input->hidden projection over all T steps at once (off the
            # serial recurrence path); gates packed lane-dense on the 128-lane axis.
            pre = jnp.dot(layer_in, w_ref[wih_r:wih_r + k_in, :],
                          preferred_element_type=jnp.float32) + bias   # (T*Bp, 4H) f32

            whh = w_ref[whh_r:whh_r + H, :]                     # (H, 4H) bf16, loop-resident

            h = jnp.zeros((Bp, H), jnp.float32)
            c = jnp.zeros((Bp, H), jnp.float32)
            is_last = layer == num_layers - 1
            for t in range(T):
                lo = t * Bp                                     # Bp=8 -> aligned sublane slice
                # Single packed recurrent matmul per step; pre-slab is the
                # accumulator (add adjacent to the dot -> MRB accumulate on v7x).
                gates = pre[lo:lo + Bp, :] + jnp.dot(
                    h.astype(jnp.bfloat16), whh,
                    preferred_element_type=jnp.float32)         # (Bp, 4H) f32
                sg = jax.nn.sigmoid(gates)                      # one full-width EUP op
                i_g = sg[:, 0 * H:1 * H]
                f_g = sg[:, 1 * H:2 * H]
                o_g = sg[:, 3 * H:4 * H]
                g_g = jnp.tanh(gates[:, 2 * H:3 * H])
                c = f_g * c + i_g * g_g
                h = o_g * jnp.tanh(c)
                if not is_last:
                    hbuf_ref[lo:lo + Bp, :] = h                 # aligned 8-row store
            if is_last:
                feat = h                                        # == out[:, -1, :]
            else:
                layer_in = hbuf_ref[...].astype(jnp.bfloat16)   # (T*Bp, H) for next layer

        # ---- MLP head: fc1 + relu, then folded fc2@fc3@fc4 (exact: the PyTorch
        # module discards the relu results between fc2/fc3/fc4). -------------------
        w1_r, _ = offs[widx]; widx += 1
        w234_r, _ = offs[widx]
        mrow = 8 * num_layers
        b1 = f_ref[mrow:mrow + 1, :]                            # (1, 128) (112 real lanes)
        b234 = f_ref[mrow + 8:mrow + 9, :]                      # (1, 128) (2A real lanes)
        noise = f_ref[mrow + 16:mrow + 16 + Bp, :]              # (Bp, 128) (A real lanes)

        h1 = jax.nn.relu(
            jnp.dot(feat.astype(jnp.bfloat16), w_ref[w1_r:w1_r + H, :],
                    preferred_element_type=jnp.float32) + b1)   # (Bp, 128); pad lanes = 0
        out = jnp.dot(h1.astype(jnp.bfloat16), w_ref[w234_r:w234_r + LANES, :],
                      preferred_element_type=jnp.float32) + b234  # (Bp, 128); 2A real lanes

        mean_logits = out[:, 0:A]
        std_logits = out[:, A:2 * A]

        def softmax(z):
            e = jnp.exp(z - jnp.max(z, axis=-1, keepdims=True))
            return e * pl.reciprocal(jnp.sum(e, axis=-1, keepdims=True), approx=True)

        mean = softmax(mean_logits)                             # (Bp, A)
        std = jax.nn.sigmoid(std_logits)                        # (Bp, A)

        # Normal(mean, std): sample via externally supplied standard-normal noise,
        # then squash through softmax exactly as in the PyTorch forward.
        sample = mean + std * noise[:, 0:A]
        action = softmax(sample)
        diff = action - mean
        # Exact reciprocal for log_prob (feeds PPO importance ratios); approx is
        # confined to the softmax above.
        log_prob = (-0.5 * (diff * diff) / (std * std)
                    - jnp.log(std)
                    - 0.5 * math.log(2.0 * math.pi))

        out_ref[...] = jnp.concatenate([action, log_prob], axis=-1)

    return kernel


def init_actor_params(key, inputsize, hiddensize, numlayers, numactions):
    """Deterministic synthetic init, mimicking PyTorch uniform(-1/sqrt(fan), ...)."""
    params = {"lstm": [], "mlp": []}
    H = hiddensize

    def uni(k, shape, fan):
        bound = 1.0 / math.sqrt(fan)
        return jax.random.uniform(k, shape, jnp.float32, -bound, bound)

    for layer in range(numlayers):
        d_in = inputsize if layer == 0 else H
        key, k1, k2, k3, k4 = jax.random.split(key, 5)
        w_ih = uni(k1, (4 * H, d_in), H)                       # PyTorch layout (4H, D)
        w_hh = uni(k2, (4 * H, H), H)                          # (4H, H)
        b = uni(k3, (1, 4 * H), H) + uni(k4, (1, 4 * H), H)    # b_ih + b_hh
        params["lstm"].append((w_ih, w_hh, b))

    dims = [(hiddensize, 112), (112, 56), (56, 28), (28, 2 * numactions)]
    for (d_in, d_out) in dims:
        key, k1, k2 = jax.random.split(key, 3)
        w = uni(k1, (d_out, d_in), d_in)                       # PyTorch layout (out, in)
        b = uni(k2, (1, d_out), d_in)
        params["mlp"].append((w, b))
    return params


def _pad2d(a, rows, cols):
    r, c = a.shape
    return jnp.pad(a, ((0, rows - r), (0, cols - c)))


def prepare_actor_inputs(params, x, noise, *, hiddensize, numlayers, numactions):
    """All layout plumbing done once, outside the kernel: time-major batch-padded
    x (bf16), one packed bf16 weight blob, one packed f32 bias+noise blob."""
    H, A = hiddensize, numactions
    B, T, D = x.shape
    Bp = BATCH_PAD
    in_pad = -(-D // 32) * 32                                  # keep slab offsets tile-aligned

    # x: (B,T,D) -> zero-pad batch/features -> time-major (T*Bp, in_pad) bf16.
    xp = jnp.pad(x, ((0, Bp - B), (0, 0), (0, in_pad - D)))
    x2d = jnp.transpose(xp, (1, 0, 2)).reshape(T * Bp, in_pad).astype(jnp.bfloat16)

    # bf16 weight blob: [W_ih, W_hh] per layer, W1, W234 — all 128 lanes wide,
    # slab row counts multiples of 32 (bf16-tile-aligned in-kernel slices).
    slabs = []
    for layer, (w_ih, w_hh, _) in enumerate(params["lstm"]):
        k_in = in_pad if layer == 0 else H
        slabs.append(_pad2d(w_ih.T, k_in, 4 * H))              # (k_in, 4H)
        slabs.append(w_hh.T)                                   # (H, 4H)

    (w1, b1), (w2, b2), (w3, b3), (w4, b4) = params["mlp"]
    w234 = w2.T @ w3.T @ w4.T                                  # (112, 2A), exact fold
    b234 = (b2 @ w3.T + b3) @ w4.T + b4                        # (1, 2A)
    slabs.append(_pad2d(w1.T, H, LANES))                       # (H, 128)
    slabs.append(_pad2d(w234, LANES, LANES))                   # (128, 128)
    wblob = jnp.concatenate(slabs, axis=0).astype(jnp.bfloat16)

    # f32 blob: per-layer LSTM biases (one 8-row block each), b1, b234, noise.
    fslabs = [_pad2d(b, 8, LANES) for (_, _, b) in params["lstm"]]
    fslabs.append(_pad2d(b1, 8, LANES))
    fslabs.append(_pad2d(b234, 8, LANES))
    fslabs.append(_pad2d(noise, Bp, LANES))
    fblob = jnp.concatenate(fslabs, axis=0).astype(jnp.float32)

    return x2d, wblob, fblob, in_pad


def actor_forward(params, x, noise, *, numlayers, hiddensize, numactions):
    assert 4 * hiddensize == LANES, "gate packing assumes hidden=32 (4H == 128 lanes)"
    B, T, _ = x.shape
    assert B <= BATCH_PAD

    x2d, wblob, fblob, in_pad = prepare_actor_inputs(
        params, x, noise,
        hiddensize=hiddensize, numlayers=numlayers, numactions=numactions)
    kernel = make_actor_kernel(numlayers, T, hiddensize, numactions, in_pad)

    # Gridless: total footprint ~100 KiB << VMEM on every TPU generation and the
    # LSTM recurrence is serial.  Only 3 input DMAs (x, weight blob, bias/noise blob).
    # TODO(synk): for non-toy batch sizes add a ("parallel",) batch grid axis so
    #             both v7x TensorCores are used.
    fused = pl.pallas_call(
        kernel,
        out_shape=jax.ShapeDtypeStruct((BATCH_PAD, 2 * numactions), jnp.float32),
        in_specs=[pl.BlockSpec(memory_space=pltpu.MemorySpace.VMEM)] * 3,
        out_specs=pl.BlockSpec(memory_space=pltpu.MemorySpace.VMEM),
        scratch_shapes=[pltpu.VMEM((T * BATCH_PAD, hiddensize), jnp.float32)],
    )(x2d, wblob, fblob)

    action = fused[:B, :numactions]
    prob = fused[:B, numactions:]
    return action, prob


if __name__ == "__main__":
    # Small shapes consistent with the module: Actor(inputsize=8, hiddensize=32,
    # numlayers=2, numactions=4), batch=2, seq=8.
    INPUTSIZE, HIDDEN, NUMLAYERS, NUMACTIONS = 8, 32, 2, 4
    BATCH, SEQ = 2, 8

    key = jax.random.PRNGKey(0)
    k_params, k_x, k_noise = jax.random.split(key, 3)

    params = init_actor_params(k_params, INPUTSIZE, HIDDEN, NUMLAYERS, NUMACTIONS)
    x = jax.random.normal(k_x, (BATCH, SEQ, INPUTSIZE), jnp.float32)
    noise = jax.random.normal(k_noise, (BATCH, NUMACTIONS), jnp.float32)

    action, prob = actor_forward(
        params, x, noise,
        numlayers=NUMLAYERS, hiddensize=HIDDEN, numactions=NUMACTIONS,
    )
    jax.block_until_ready((action, prob))

    assert action.shape == (BATCH, NUMACTIONS) and prob.shape == (BATCH, NUMACTIONS)
    assert bool(jnp.all(jnp.isfinite(action))) and bool(jnp.all(jnp.isfinite(prob)))
    print("KERNEL_OK")
</pallas_src>

<mosaic_0001>
module attributes {stable_mosaic.version = 11 : i64} {
  func.func @kernel(%arg0: memref<64x32xbf16, #tpu.memory_space<vmem>>, %arg1: memref<288x128xbf16, #tpu.memory_space<vmem>>, %arg2: memref<40x128xf32, #tpu.memory_space<vmem>>, %arg3: memref<8x8xf32, #tpu.memory_space<vmem>>, %arg4: memref<64x32xf32, #tpu.memory_space<vmem>>) attributes {dimension_semantics = [], scalar_prefetch = 0 : i64, scratch_operands = 1 : i64, tpu.core_type = #tpu.core_type<tc>} {
    %c0 = arith.constant 0 : index
    %c0_0 = arith.constant 0 : index
    %0 = vector.load %arg0[%c0, %c0_0] : memref<64x32xbf16, #tpu.memory_space<vmem>>, vector<64x32xbf16>
    %c0_1 = arith.constant 0 : index
    %c0_2 = arith.constant 0 : index
    %1 = vector.load %arg2[%c0_1, %c0_2] : memref<40x128xf32, #tpu.memory_space<vmem>>, vector<1x128xf32>
    %c0_3 = arith.constant 0 : index
    %c0_4 = arith.constant 0 : index
    %2 = vector.load %arg1[%c0_3, %c0_4] : memref<288x128xbf16, #tpu.memory_space<vmem>>, vector<32x128xbf16>
    %cst = arith.constant dense<0.000000e+00> : vector<64x128xf32>
    %3 = tpu.matmul %0, %2, %cst {dimension_numbers = #tpu.dot_dimension_numbers<[1], [0], [0], [1], [0, 0, 1, 1], [], []>} : vector<64x32xbf16>, vector<32x128xbf16>, vector<64x128xf32> -> vector<64x128xf32>
    %4 = vector.broadcast %1 : vector<1x128xf32> to vector<64x128xf32>
    %5 = arith.addf %3, %4 : vector<64x128xf32>
    %c32 = arith.constant 32 : index
    %c0_5 = arith.constant 0 : index
    %6 = vector.load %arg1[%c32, %c0_5] : memref<288x128xbf16, #tpu.memory_space<vmem>>, vector<32x128xbf16>
    %cst_6 = arith.constant 0.000000e+00 : f32
    %7 = vector.broadcast %cst_6 : f32 to vector<8x32xf32>
    %cst_7 = arith.constant 0.000000e+00 : f32
    %8 = vector.broadcast %cst_7 : f32 to vector<8x32xf32>
    %9 = vector.extract_strided_slice %5 {offsets = [0, 0], sizes = [8, 128], strides = [1, 1]} : vector<64x128xf32> to vector<8x128xf32>
    %10 = arith.truncf %7 : vector<8x32xf32> to vector<8x32xbf16>
    %cst_8 = arith.constant dense<0.000000e+00> : vector<8x128xf32>
    %11 = tpu.matmul %10, %6, %cst_8 {dimension_numbers = #tpu.dot_dimension_numbers<[1], [0], [0], [1], [0, 0, 1, 1], [], []>} : vector<8x32xbf16>, vector<32x128xbf16>, vector<8x128xf32> -> vector<8x128xf32>
    %12 = arith.addf %9, %11 : vector<8x128xf32>
    %13 = arith.negf %12 : vector<8x128xf32>
    %14 = math.exp %13 : vector<8x128xf32>
    %cst_9 = arith.constant 1.000000e+00 : f32
    %15 = vector.broadcast %cst_9 : f32 to vector<8x128xf32>
    %16 = arith.addf %15, %14 : vector<8x128xf32>
    %17 = arith.divf %15, %16 : vector<8x128xf32>
    %18 = vector.extract_strided_slice %17 {offsets = [0, 0], sizes = [8, 32], strides = [1, 1]} : vector<8x128xf32> to vector<8x32xf32>
    %19 = vector.extract_strided_slice %17 {offsets = [0, 32], sizes = [8, 32], strides = [1, 1]} : vector<8x128xf32> to vector<8x32xf32>
    %20 = vector.extract_strided_slice %17 {offsets = [0, 96], sizes = [8, 32], strides = [1, 1]} : vector<8x128xf32> to vector<8x32xf32>
    %21 = vector.extract_strided_slice %12 {offsets = [0, 64], sizes = [8, 32], strides = [1, 1]} : vector<8x128xf32> to vector<8x32xf32>
    %22 = math.tanh %21 : vector<8x32xf32>
    %23 = arith.mulf %19, %8 : vector<8x32xf32>
    %24 = arith.mulf %18, %22 : vector<8x32xf32>
    %25 = arith.addf %23, %24 : vector<8x32xf32>
    %26 = math.tanh %25 : vector<8x32xf32>
    %27 = arith.mulf %20, %26 : vector<8x32xf32>
    %c0_10 = arith.constant 0 : index
    %c0_11 = arith.constant 0 : index
    %28 = vector.load %arg4[%c0_10, %c0_11] : memref<64x32xf32, #tpu.memory_space<vmem>>, vector<8x32xf32>
    tpu.vector_store %arg4[%c0_10, %c0_11], %27 {strides = array<i32>} : memref<64x32xf32, #tpu.memory_space<vmem>>, vector<8x32xf32>,
    %29 = vector.extract_strided_slice %5 {offsets = [8, 0], sizes = [8, 128], strides = [1, 1]} : vector<64x128xf32> to vector<8x128xf32>
    %30 = arith.truncf %27 : vector<8x32xf32> to vector<8x32xbf16>
    %cst_12 = arith.constant dense<0.000000e+00> : vector<8x128xf32>
    %31 = tpu.matmul %30, %6, %cst_12 {dimension_numbers = #tpu.dot_dimension_numbers<[1], [0], [0], [1], [0, 0, 1, 1], [], []>} : vector<8x32xbf16>, vector<32x128xbf16>, vector<8x128xf32> -> vector<8x128xf32>
    %32 = arith.addf %29, %31 : vector<8x128xf32>
    %33 = arith.negf %32 : vector<8x128xf32>
    %34 = math.exp %33 : vector<8x128xf32>
    %cst_13 = arith.constant 1.000000e+00 : f32
    %35 = vector.broadcast %cst_13 : f32 to vector<8x128xf32>
    %36 = arith.addf %35, %34 : vector<8x128xf32>
    %37 = arith.divf %35, %36 : vector<8x128xf32>
    %38 = vector.extract_strided_slice %37 {offsets = [0, 0], sizes = [8, 32], strides = [1, 1]} : vector<8x128xf32> to vector<8x32xf32>
    %39 = vector.extract_strided_slice %37 {offsets = [0, 32], sizes = [8, 32], strides = [1, 1]} : vector<8x128xf32> to vector<8x32xf32>
    %40 = vector.extract_strided_slice %37 {offsets = [0, 96], sizes = [8, 32], strides = [1, 1]} : vector<8x128xf32> to vector<8x32xf32>
    %41 = vector.extract_strided_slice %32 {offsets = [0, 64], sizes = [8, 32], strides = [1, 1]} : vector<8x128xf32> to vector<8x32xf32>
    %42 = math.tanh %41 : vector<8x32xf32>
    %43 = arith.mulf %39, %25 : vector<8x32xf32>
    %44 = arith.mulf %38, %42 : vector<8x32xf32>
    %45 = arith.addf %43, %44 : vector<8x32xf32>
    %46 = math.tanh %45 : vector<8x32xf32>
    %47 = arith.mulf %40, %46 : vector<8x32xf32>
    %c8 = arith.constant 8 : index
    %c0_14 = arith.constant 0 : index
    %48 = vector.load %arg4[%c8, %c0_14] : memref<64x32xf32, #tpu.memory_space<vmem>>, vector<8x32xf32>
    tpu.vector_store %arg4[%c8, %c0_14], %47 {strides = array<i32>} : memref<64x32xf32, #tpu.memory_space<vmem>>, vector<8x32xf32>,
    %49 = vector.extract_strided_slice %5 {offsets = [16, 0], sizes = [8, 128], strides = [1, 1]} : vector<64x128xf32> to vector<8x128xf32>
    %50 = arith.truncf %47 : vector<8x32xf32> to vector<8x32xbf16>
    %cst_15 = arith.constant dense<0.000000e+00> : vector<8x128xf32>
    %51 = tpu.matmul %50, %6, %cst_15 {dimension_numbers = #tpu.dot_dimension_numbers<[1], [0], [0], [1], [0, 0, 1, 1], [], []>} : vector<8x32xbf16>, vector<32x128xbf16>, vector<8x128xf32> -> vector<8x128xf32>
    %52 = arith.addf %49, %51 : vector<8x128xf32>
    %53 = arith.negf %52 : vector<8x128xf32>
    %54 = math.exp %53 : vector<8x128xf32>
    %cst_16 = arith.constant 1.000000e+00 : f32
    %55 = vector.broadcast %cst_16 : f32 to vector<8x128xf32>
    %56 = arith.addf %55, %54 : vector<8x128xf32>
    %57 = arith.divf %55, %56 : vector<8x128xf32>
    %58 = vector.extract_strided_slice %57 {offsets = [0, 0], sizes = [8, 32], strides = [1, 1]} : vector<8x128xf32> to vector<8x32xf32>
    %59 = vector.extract_strided_slice %57 {offsets = [0, 32], sizes = [8, 32], strides = [1, 1]} : vector<8x128xf32> to vector<8x32xf32>
    %60 = vector.extract_strided_slice %57 {offsets = [0, 96], sizes = [8, 32], strides = [1, 1]} : vector<8x128xf32> to vector<8x32xf32>
    %61 = vector.extract_strided_slice %52 {offsets = [0, 64], sizes = [8, 32], strides = [1, 1]} : vector<8x128xf32> to vector<8x32xf32>
    %62 = math.tanh %61 : vector<8x32xf32>
    %63 = arith.mulf %59, %45 : vector<8x32xf32>
    %64 = arith.mulf %58, %62 : vector<8x32xf32>
    %65 = arith.addf %63, %64 : vector<8x32xf32>
    %66 = math.tanh %65 : vector<8x32xf32>
    %67 = arith.mulf %60, %66 : vector<8x32xf32>
    %c16 = arith.constant 16 : index
    %c0_17 = arith.constant 0 : index
    %68 = vector.load %arg4[%c16, %c0_17] : memref<64x32xf32, #tpu.memory_space<vmem>>, vector<8x32xf32>
    tpu.vector_store %arg4[%c16, %c0_17], %67 {strides = array<i32>} : memref<64x32xf32, #tpu.memory_space<vmem>>, vector<8x32xf32>,
    %69 = vector.extract_strided_slice %5 {offsets = [24, 0], sizes = [8, 128], strides = [1, 1]} : vector<64x128xf32> to vector<8x128xf32>
    %70 = arith.truncf %67 : vector<8x32xf32> to vector<8x32xbf16>
    %cst_18 = arith.constant dense<0.000000e+00> : vector<8x128xf32>
    %71 = tpu.matmul %70, %6, %cst_18 {dimension_numbers = #tpu.dot_dimension_numbers<[1], [0], [0], [1], [0, 0, 1, 1], [], []>} : vector<8x32xbf16>, vector<32x128xbf16>, vector<8x128xf32> -> vector<8x128xf32>
    %72 = arith.addf %69, %71 : vector<8x128xf32>
    %73 = arith.negf %72 : vector<8x128xf32>
    %74 = math.exp %73 : vector<8x128xf32>
    %cst_19 = arith.constant 1.000000e+00 : f32
    %75 = vector.broadcast %cst_19 : f32 to vector<8x128xf32>
    %76 = arith.addf %75, %74 : vector<8x128xf32>
    %77 = arith.divf %75, %76 : vector<8x128xf32>
    %78 = vector.extract_strided_slice %77 {offsets = [0, 0], sizes = [8, 32], strides = [1, 1]} : vector<8x128xf32> to vector<8x32xf32>
    %79 = vector.extract_strided_slice %77 {offsets = [0, 32], sizes = [8, 32], strides = [1, 1]} : vector<8x128xf32> to vector<8x32xf32>
    %80 = vector.extract_strided_slice %77 {offsets = [0, 96], sizes = [8, 32], strides = [1, 1]} : vector<8x128xf32> to vector<8x32xf32>
    %81 = vector.extract_strided_slice %72 {offsets = [0, 64], sizes = [8, 32], strides = [1, 1]} : vector<8x128xf32> to vector<8x32xf32>
    %82 = math.tanh %81 : vector<8x32xf32>
    %83 = arith.mulf %79, %65 : vector<8x32xf32>
    %84 = arith.mulf %78, %82 : vector<8x32xf32>
    %85 = arith.addf %83, %84 : vector<8x32xf32>
    %86 = math.tanh %85 : vector<8x32xf32>
    %87 = arith.mulf %80, %86 : vector<8x32xf32>
    %c24 = arith.constant 24 : index
    %c0_20 = arith.constant 0 : index
    %88 = vector.load %arg4[%c24, %c0_20] : memref<64x32xf32, #tpu.memory_space<vmem>>, vector<8x32xf32>
    tpu.vector_store %arg4[%c24, %c0_20], %87 {strides = array<i32>} : memref<64x32xf32, #tpu.memory_space<vmem>>, vector<8x32xf32>,
    %89 = vector.extract_strided_slice %5 {offsets = [32, 0], sizes = [8, 128], strides = [1, 1]} : vector<64x128xf32> to vector<8x128xf32>
    %90 = arith.truncf %87 : vector<8x32xf32> to vector<8x32xbf16>
    %cst_21 = arith.constant dense<0.000000e+00> : vector<8x128xf32>
    %91 = tpu.matmul %90, %6, %cst_21 {dimension_numbers = #tpu.dot_dimension_numbers<[1], [0], [0], [1], [0, 0, 1, 1], [], []>} : vector<8x32xbf16>, vector<32x128xbf16>, vector<8x128xf32> -> vector<8x128xf32>
    %92 = arith.addf %89, %91 : vector<8x128xf32>
    %93 = arith.negf %92 : vector<8x128xf32>
    %94 = math.exp %93 : vector<8x128xf32>
    %cst_22 = arith.constant 1.000000e+00 : f32
    %95 = vector.broadcast %cst_22 : f32 to vector<8x128xf32>
    %96 = arith.addf %95, %94 : vector<8x128xf32>
    %97 = arith.divf %95, %96 : vector<8x128xf32>
    %98 = vector.extract_strided_slice %97 {offsets = [0, 0], sizes = [8, 32], strides = [1, 1]} : vector<8x128xf32> to vector<8x32xf32>
    %99 = vector.extract_strided_slice %97 {offsets = [0, 32], sizes = [8, 32], strides = [1, 1]} : vector<8x128xf32> to vector<8x32xf32>
    %100 = vector.extract_strided_slice %97 {offsets = [0, 96], sizes = [8, 32], strides = [1, 1]} : vector<8x128xf32> to vector<8x32xf32>
    %101 = vector.extract_strided_slice %92 {offsets = [0, 64], sizes = [8, 32], strides = [1, 1]} : vector<8x128xf32> to vector<8x32xf32>
    %102 = math.tanh %101 : vector<8x32xf32>
    %103 = arith.mulf %99, %85 : vector<8x32xf32>
    %104 = arith.mulf %98, %102 : vector<8x32xf32>
    %105 = arith.addf %103, %104 : vector<8x32xf32>
    %106 = math.tanh %105 : vector<8x32xf32>
    %107 = arith.mulf %100, %106 : vector<8x32xf32>
    %c32_23 = arith.constant 32 : index
    %c0_24 = arith.constant 0 : index
    %108 = vector.load %arg4[%c32_23, %c0_24] : memref<64x32xf32, #tpu.memory_space<vmem>>, vector<8x32xf32>
    tpu.vector_store %arg4[%c32_23, %c0_24], %107 {strides = array<i32>} : memref<64x32xf32, #tpu.memory_space<vmem>>, vector<8x32xf32>,
    %109 = vector.extract_strided_slice %5 {offsets = [40, 0], sizes = [8, 128], strides = [1, 1]} : vector<64x128xf32> to vector<8x128xf32>
    %110 = arith.truncf %107 : vector<8x32xf32> to vector<8x32xbf16>
    %cst_25 = arith.constant dense<0.000000e+00> : vector<8x128xf32>
    %111 = tpu.matmul %110, %6, %cst_25 {dimension_numbers = #tpu.dot_dimension_numbers<[1], [0], [0], [1], [0, 0, 1, 1], [], []>} : vector<8x32xbf16>, vector<32x128xbf16>, vector<8x128xf32> -> vector<8x128xf32>
    %112 = arith.addf %109, %111 : vector<8x128xf32>
    %113 = arith.negf %112 : vector<8x128xf32>
    %114 = math.exp %113 : vector<8x128xf32>
    %cst_26 = arith.constant 1.000000e+00 : f32
    %115 = vector.broadcast %cst_26 : f32 to vector<8x128xf32>
    %116 = arith.addf %115, %114 : vector<8x128xf32>
    %117 = arith.divf %115, %116 : vector<8x128xf32>
    %118 = vector.extract_strided_slice %117 {offsets = [0, 0], sizes = [8, 32], strides = [1, 1]} : vector<8x128xf32> to vector<8x32xf32>
    %119 = vector.extract_strided_slice %117 {offsets = [0, 32], sizes = [8, 32], strides = [1, 1]} : vector<8x128xf32> to vector<8x32xf32>
    %120 = vector.extract_strided_slice %117 {offsets = [0, 96], sizes = [8, 32], strides = [1, 1]} : vector<8x128xf32> to vector<8x32xf32>
    %121 = vector.extract_strided_slice %112 {offsets = [0, 64], sizes = [8, 32], strides = [1, 1]} : vector<8x128xf32> to vector<8x32xf32>
    %122 = math.tanh %121 : vector<8x32xf32>
    %123 = arith.mulf %119, %105 : vector<8x32xf32>
    %124 = arith.mulf %118, %122 : vector<8x32xf32>
    %125 = arith.addf %123, %124 : vector<8x32xf32>
    %126 = math.tanh %125 : vector<8x32xf32>
    %127 = arith.mulf %120, %126 : vector<8x32xf32>
    %c40 = arith.constant 40 : index
    %c0_27 = arith.constant 0 : index
    %128 = vector.load %arg4[%c40, %c0_27] : memref<64x32xf32, #tpu.memory_space<vmem>>, vector<8x32xf32>
    tpu.vector_store %arg4[%c40, %c0_27], %127 {strides = array<i32>} : memref<64x32xf32, #tpu.memory_space<vmem>>, vector<8x32xf32>,
    %129 = vector.extract_strided_slice %5 {offsets = [48, 0], sizes = [8, 128], strides = [1, 1]} : vector<64x128xf32> to vector<8x128xf32>
    %130 = arith.truncf %127 : vector<8x32xf32> to vector<8x32xbf16>
    %cst_28 = arith.constant dense<0.000000e+00> : vector<8x128xf32>
    %131 = tpu.matmul %130, %6, %cst_28 {dimension_numbers = #tpu.dot_dimension_numbers<[1], [0], [0], [1], [0, 0, 1, 1], [], []>} : vector<8x32xbf16>, vector<32x128xbf16>, vector<8x128xf32> -> vector<8x128xf32>
    %132 = arith.addf %129, %131 : vector<8x128xf32>
    %133 = arith.negf %132 : vector<8x128xf32>
    %134 = math.exp %133 : vector<8x128xf32>
    %cst_29 = arith.constant 1.000000e+00 : f32
    %135 = vector.broadcast %cst_29 : f32 to vector<8x128xf32>
    %136 = arith.addf %135, %134 : vector<8x128xf32>
    %137 = arith.divf %135, %136 : vector<8x128xf32>
    %138 = vector.extract_strided_slice %137 {offsets = [0, 0], sizes = [8, 32], strides = [1, 1]} : vector<8x128xf32> to vector<8x32xf32>
    %139 = vector.extract_strided_slice %137 {offsets = [0, 32], sizes = [8, 32], strides = [1, 1]} : vector<8x128xf32> to vector<8x32xf32>
    %140 = vector.extract_strided_slice %137 {offsets = [0, 96], sizes = [8, 32], strides = [1, 1]} : vector<8x128xf32> to vector<8x32xf32>
    %141 = vector.extract_strided_slice %132 {offsets = [0, 64], sizes = [8, 32], strides = [1, 1]} : vector<8x128xf32> to vector<8x32xf32>
    %142 = math.tanh %141 : vector<8x32xf32>
    %143 = arith.mulf %139, %125 : vector<8x32xf32>
    %144 = arith.mulf %138, %142 : vector<8x32xf32>
    %145 = arith.addf %143, %144 : vector<8x32xf32>
    %146 = math.tanh %145 : vector<8x32xf32>
    %147 = arith.mulf %140, %146 : vector<8x32xf32>
    %c48 = arith.constant 48 : index
    %c0_30 = arith.constant 0 : index
    %148 = vector.load %arg4[%c48, %c0_30] : memref<64x32xf32, #tpu.memory_space<vmem>>, vector<8x32xf32>
    tpu.vector_store %arg4[%c48, %c0_30], %147 {strides = array<i32>} : memref<64x32xf32, #tpu.memory_space<vmem>>, vector<8x32xf32>,
    %149 = vector.extract_strided_slice %5 {offsets = [56, 0], sizes = [8, 128], strides = [1, 1]} : vector<64x128xf32> to vector<8x128xf32>
    %150 = arith.truncf %147 : vector<8x32xf32> to vector<8x32xbf16>
    %cst_31 = arith.constant dense<0.000000e+00> : vector<8x128xf32>
    %151 = tpu.matmul %150, %6, %cst_31 {dimension_numbers = #tpu.dot_dimension_numbers<[1], [0], [0], [1], [0, 0, 1, 1], [], []>} : vector<8x32xbf16>, vector<32x128xbf16>, vector<8x128xf32> -> vector<8x128xf32>
    %152 = arith.addf %149, %151 : vector<8x128xf32>
    %153 = arith.negf %152 : vector<8x128xf32>
    %154 = math.exp %153 : vector<8x128xf32>
    %cst_32 = arith.constant 1.000000e+00 : f32
    %155 = vector.broadcast %cst_32 : f32 to vector<8x128xf32>
    %156 = arith.addf %155, %154 : vector<8x128xf32>
    %157 = arith.divf %155, %156 : vector<8x128xf32>
    %158 = vector.extract_strided_slice %157 {offsets = [0, 0], sizes = [8, 32], strides = [1, 1]} : vector<8x128xf32> to vector<8x32xf32>
    %159 = vector.extract_strided_slice %157 {offsets = [0, 32], sizes = [8, 32], strides = [1, 1]} : vector<8x128xf32> to vector<8x32xf32>
    %160 = vector.extract_strided_slice %157 {offsets = [0, 96], sizes = [8, 32], strides = [1, 1]} : vector<8x128xf32> to vector<8x32xf32>
    %161 = vector.extract_strided_slice %152 {offsets = [0, 64], sizes = [8, 32], strides = [1, 1]} : vector<8x128xf32> to vector<8x32xf32>
    %162 = math.tanh %161 : vector<8x32xf32>
    %163 = arith.mulf %159, %145 : vector<8x32xf32>
    %164 = arith.mulf %158, %162 : vector<8x32xf32>
    %165 = arith.addf %163, %164 : vector<8x32xf32>
    %166 = math.tanh %165 : vector<8x32xf32>
    %167 = arith.mulf %160, %166 : vector<8x32xf32>
    %c56 = arith.constant 56 : index
    %c0_33 = arith.constant 0 : index
    %168 = vector.load %arg4[%c56, %c0_33] : memref<64x32xf32, #tpu.memory_space<vmem>>, vector<8x32xf32>
    tpu.vector_store %arg4[%c56, %c0_33], %167 {strides = array<i32>} : memref<64x32xf32, #tpu.memory_space<vmem>>, vector<8x32xf32>,
    %c0_34 = arith.constant 0 : index
    %c0_35 = arith.constant 0 : index
    %169 = vector.load %arg4[%c0_34, %c0_35] : memref<64x32xf32, #tpu.memory_space<vmem>>, vector<64x32xf32>
    %170 = arith.truncf %169 : vector<64x32xf32> to vector<64x32xbf16>
    %c8_36 = arith.constant 8 : index
    %c0_37 = arith.constant 0 : index
    %171 = vector.load %arg2[%c8_36, %c0_37] : memref<40x128xf32, #tpu.memory_space<vmem>>, vector<1x128xf32>
    %c64 = arith.constant 64 : index
    %c0_38 = arith.constant 0 : index
    %172 = vector.load %arg1[%c64, %c0_38] : memref<288x128xbf16, #tpu.memory_space<vmem>>, vector<32x128xbf16>
    %cst_39 = arith.constant dense<0.000000e+00> : vector<64x128xf32>
    %173 = tpu.matmul %170, %172, %cst_39 {dimension_numbers = #tpu.dot_dimension_numbers<[1], [0], [0], [1], [0, 0, 1, 1], [], []>} : vector<64x32xbf16>, vector<32x128xbf16>, vector<64x128xf32> -> vector<64x128xf32>
    %174 = vector.broadcast %171 : vector<1x128xf32> to vector<64x128xf32>
    %175 = arith.addf %173, %174 : vector<64x128xf32>
    %c96 = arith.constant 96 : index
    %c0_40 = arith.constant 0 : index
    %176 = vector.load %arg1[%c96, %c0_40] : memref<288x128xbf16, #tpu.memory_space<vmem>>, vector<32x128xbf16>
    %cst_41 = arith.constant 0.000000e+00 : f32
    %177 = vector.broadcast %cst_41 : f32 to vector<8x32xf32>
    %cst_42 = arith.constant 0.000000e+00 : f32
    %178 = vector.broadcast %cst_42 : f32 to vector<8x32xf32>
    %179 = vector.extract_strided_slice %175 {offsets = [0, 0], sizes = [8, 128], strides = [1, 1]} : vector<64x128xf32> to vector<8x128xf32>
    %180 = arith.truncf %177 : vector<8x32xf32> to vector<8x32xbf16>
    %cst_43 = arith.constant dense<0.000000e+00> : vector<8x128xf32>
    %181 = tpu.matmul %180, %176, %cst_43 {dimension_numbers = #tpu.dot_dimension_numbers<[1], [0], [0], [1], [0, 0, 1, 1], [], []>} : vector<8x32xbf16>, vector<32x128xbf16>, vector<8x128xf32> -> vector<8x128xf32>
    %182 = arith.addf %179, %181 : vector<8x128xf32>
    %183 = arith.negf %182 : vector<8x128xf32>
    %184 = math.exp %183 : vector<8x128xf32>
    %cst_44 = arith.constant 1.000000e+00 : f32
    %185 = vector.broadcast %cst_44 : f32 to vector<8x128xf32>
    %186 = arith.addf %185, %184 : vector<8x128xf32>
    %187 = arith.divf %185, %186 : vector<8x128xf32>
    %188 = vector.extract_strided_slice %187 {offsets = [0, 0], sizes = [8, 32], strides = [1, 1]} : vector<8x128xf32> to vector<8x32xf32>
    %189 = vector.extract_strided_slice %187 {offsets = [0, 32], sizes = [8, 32], strides = [1, 1]} : vector<8x128xf32> to vector<8x32xf32>
    %190 = vector.extract_strided_slice %187 {offsets = [0, 96], sizes = [8, 32], strides = [1, 1]} : vector<8x128xf32> to vector<8x32xf32>
    %191 = vector.extract_strided_slice %182 {offsets = [0, 64], sizes = [8, 32], strides = [1, 1]} : vector<8x128xf32> to vector<8x32xf32>
    %192 = math.tanh %191 : vector<8x32xf32>
    %193 = arith.mulf %189, %178 : vector<8x32xf32>
    %194 = arith.mulf %188, %192 : vector<8x32xf32>
    %195 = arith.addf %193, %194 : vector<8x32xf32>
    %196 = math.tanh %195 : vector<8x32xf32>
    %197 = arith.mulf %190, %196 : vector<8x32xf32>
    %198 = vector.extract_strided_slice %175 {offsets = [8, 0], sizes = [8, 128], strides = [1, 1]} : vector<64x128xf32> to vector<8x128xf32>
    %199 = arith.truncf %197 : vector<8x32xf32> to vector<8x32xbf16>
    %cst_45 = arith.constant dense<0.000000e+00> : vector<8x128xf32>
    %200 = tpu.matmul %199, %176, %cst_45 {dimension_numbers = #tpu.dot_dimension_numbers<[1], [0], [0], [1], [0, 0, 1, 1], [], []>} : vector<8x32xbf16>, vector<32x128xbf16>, vector<8x128xf32> -> vector<8x128xf32>
    %201 = arith.addf %198, %200 : vector<8x128xf32>
    %202 = arith.negf %201 : vector<8x128xf32>
    %203 = math.exp %202 : vector<8x128xf32>
    %cst_46 = arith.constant 1.000000e+00 : f32
    %204 = vector.broadcast %cst_46 : f32 to vector<8x128xf32>
    %205 = arith.addf %204, %203 : vector<8x128xf32>
    %206 = arith.divf %204, %205 : vector<8x128xf32>
    %207 = vector.extract_strided_slice %206 {offsets = [0, 0], sizes = [8, 32], strides = [1, 1]} : vector<8x128xf32> to vector<8x32xf32>
    %208 = vector.extract_strided_slice %206 {offsets = [0, 32], sizes = [8, 32], strides = [1, 1]} : vector<8x128xf32> to vector<8x32xf32>
    %209 = vector.extract_strided_slice %206 {offsets = [0, 96], sizes = [8, 32], strides = [1, 1]} : vector<8x128xf32> to vector<8x32xf32>
    %210 = vector.extract_strided_slice %201 {offsets = [0, 64], sizes = [8, 32], strides = [1, 1]} : vector<8x128xf32> to vector<8x32xf32>
    %211 = math.tanh %210 : vector<8x32xf32>
    %212 = arith.mulf %208, %195 : vector<8x32xf32>
    %213 = arith.mulf %207, %211 : vector<8x32xf32>
    %214 = arith.addf %212, %213 : vector<8x32xf32>
    %215 = math.tanh %214 : vector<8x32xf32>
    %216 = arith.mulf %209, %215 : vector<8x32xf32>
    %217 = vector.extract_strided_slice %175 {offsets = [16, 0], sizes = [8, 128], strides = [1, 1]} : vector<64x128xf32> to vector<8x128xf32>
    %218 = arith.truncf %216 : vector<8x32xf32> to vector<8x32xbf16>
    %cst_47 = arith.constant dense<0.000000e+00> : vector<8x128xf32>
    %219 = tpu.matmul %218, %176, %cst_47 {dimension_numbers = #tpu.dot_dimension_numbers<[1], [0], [0], [1], [0, 0, 1, 1], [], []>} : vector<8x32xbf16>, vector<32x128xbf16>, vector<8x128xf32> -> vector<8x128xf32>
    %220 = arith.addf %217, %219 : vector<8x128xf32>
    %221 = arith.negf %220 : vector<8x128xf32>
    %222 = math.exp %221 : vector<8x128xf32>
    %cst_48 = arith.constant 1.000000e+00 : f32
    %223 = vector.broadcast %cst_48 : f32 to vector<8x128xf32>
    %224 = arith.addf %223, %222 : vector<8x128xf32>
    %225 = arith.divf %223, %224 : vector<8x128xf32>
    %226 = vector.extract_strided_slice %225 {offsets = [0, 0], sizes = [8, 32], strides = [1, 1]} : vector<8x128xf32> to vector<8x32xf32>
    %227 = vector.extract_strided_slice %225 {offsets = [0, 32], sizes = [8, 32], strides = [1, 1]} : vector<8x128xf32> to vector<8x32xf32>
    %228 = vector.extract_strided_slice %225 {offsets = [0, 96], sizes = [8, 32], strides = [1, 1]} : vector<8x128xf32> to vector<8x32xf32>
    %229 = vector.extract_strided_slice %220 {offsets = [0, 64], sizes = [8, 32], strides = [1, 1]} : vector<8x128xf32> to vector<8x32xf32>
    %230 = math.tanh %229 : vector<8x32xf32>
    %231 = arith.mulf %227, %214 : vector<8x32xf32>
    %232 = arith.mulf %226, %230 : vector<8x32xf32>
    %233 = arith.addf %231, %232 : vector<8x32xf32>
    %234 = math.tanh %233 : vector<8x32xf32>
    %235 = arith.mulf %228, %234 : vector<8x32xf32>
    %236 = vector.extract_strided_slice %175 {offsets = [24, 0], sizes = [8, 128], strides = [1, 1]} : vector<64x128xf32> to vector<8x128xf32>
    %237 = arith.truncf %235 : vector<8x32xf32> to vector<8x32xbf16>
    %cst_49 = arith.constant dense<0.000000e+00> : vector<8x128xf32>
    %238 = tpu.matmul %237, %176, %cst_49 {dimension_numbers = #tpu.dot_dimension_numbers<[1], [0], [0], [1], [0, 0, 1, 1], [], []>} : vector<8x32xbf16>, vector<32x128xbf16>, vector<8x128xf32> -> vector<8x128xf32>
    %239 = arith.addf %236, %238 : vector<8x128xf32>
    %240 = arith.negf %239 : vector<8x128xf32>
    %241 = math.exp %240 : vector<8x128xf32>
    %cst_50 = arith.constant 1.000000e+00 : f32
    %242 = vector.broadcast %cst_50 : f32 to vector<8x128xf32>
    %243 = arith.addf %242, %241 : vector<8x128xf32>
    %244 = arith.divf %242, %243 : vector<8x128xf32>
    %245 = vector.extract_strided_slice %244 {offsets = [0, 0], sizes = [8, 32], strides = [1, 1]} : vector<8x128xf32> to vector<8x32xf32>
    %246 = vector.extract_strided_slice %244 {offsets = [0, 32], sizes = [8, 32], strides = [1, 1]} : vector<8x128xf32> to vector<8x32xf32>
    %247 = vector.extract_strided_slice %244 {offsets = [0, 96], sizes = [8, 32], strides = [1, 1]} : vector<8x128xf32> to vector<8x32xf32>
    %248 = vector.extract_strided_slice %239 {offsets = [0, 64], sizes = [8, 32], strides = [1, 1]} : vector<8x128xf32> to vector<8x32xf32>
    %249 = math.tanh %248 : vector<8x32xf32>
    %250 = arith.mulf %246, %233 : vector<8x32xf32>
    %251 = arith.mulf %245, %249 : vector<8x32xf32>
    %252 = arith.addf %250, %251 : vector<8x32xf32>
    %253 = math.tanh %252 : vector<8x32xf32>
    %254 = arith.mulf %247, %253 : vector<8x32xf32>
    %255 = vector.extract_strided_slice %175 {offsets = [32, 0], sizes = [8, 128], strides = [1, 1]} : vector<64x128xf32> to vector<8x128xf32>
    %256 = arith.truncf %254 : vector<8x32xf32> to vector<8x32xbf16>
    %cst_51 = arith.constant dense<0.000000e+00> : vector<8x128xf32>
    %257 = tpu.matmul %256, %176, %cst_51 {dimension_numbers = #tpu.dot_dimension_numbers<[1], [0], [0], [1], [0, 0, 1, 1], [], []>} : vector<8x32xbf16>, vector<32x128xbf16>, vector<8x128xf32> -> vector<8x128xf32>
    %258 = arith.addf %255, %257 : vector<8x128xf32>
    %259 = arith.negf %258 : vector<8x128xf32>
    %260 = math.exp %259 : vector<8x128xf32>
    %cst_52 = arith.constant 1.000000e+00 : f32
    %261 = vector.broadcast %cst_52 : f32 to vector<8x128xf32>
    %262 = arith.addf %261, %260 : vector<8x128xf32>
    %263 = arith.divf %261, %262 : vector<8x128xf32>
    %264 = vector.extract_strided_slice %263 {offsets = [0, 0], sizes = [8, 32], strides = [1, 1]} : vector<8x128xf32> to vector<8x32xf32>
    %265 = vector.extract_strided_slice %263 {offsets = [0, 32], sizes = [8, 32], strides = [1, 1]} : vector<8x128xf32> to vector<8x32xf32>
    %266 = vector.extract_strided_slice %263 {offsets = [0, 96], sizes = [8, 32], strides = [1, 1]} : vector<8x128xf32> to vector<8x32xf32>
    %267 = vector.extract_strided_slice %258 {offsets = [0, 64], sizes = [8, 32], strides = [1, 1]} : vector<8x128xf32> to vector<8x32xf32>
    %268 = math.tanh %267 : vector<8x32xf32>
    %269 = arith.mulf %265, %252 : vector<8x32xf32>
    %270 = arith.mulf %264, %268 : vector<8x32xf32>
    %271 = arith.addf %269, %270 : vector<8x32xf32>
    %272 = math.tanh %271 : vector<8x32xf32>
    %273 = arith.mulf %266, %272 : vector<8x32xf32>
    %274 = vector.extract_strided_slice %175 {offsets = [40, 0], sizes = [8, 128], strides = [1, 1]} : vector<64x128xf32> to vector<8x128xf32>
    %275 = arith.truncf %273 : vector<8x32xf32> to vector<8x32xbf16>
    %cst_53 = arith.constant dense<0.000000e+00> : vector<8x128xf32>
    %276 = tpu.matmul %275, %176, %cst_53 {dimension_numbers = #tpu.dot_dimension_numbers<[1], [0], [0], [1], [0, 0, 1, 1], [], []>} : vector<8x32xbf16>, vector<32x128xbf16>, vector<8x128xf32> -> vector<8x128xf32>
    %277 = arith.addf %274, %276 : vector<8x128xf32>
    %278 = arith.negf %277 : vector<8x128xf32>
    %279 = math.exp %278 : vector<8x128xf32>
    %cst_54 = arith.constant 1.000000e+00 : f32
    %280 = vector.broadcast %cst_54 : f32 to vector<8x128xf32>
    %281 = arith.addf %280, %279 : vector<8x128xf32>
    %282 = arith.divf %280, %281 : vector<8x128xf32>
    %283 = vector.extract_strided_slice %282 {offsets = [0, 0], sizes = [8, 32], strides = [1, 1]} : vector<8x128xf32> to vector<8x32xf32>
    %284 = vector.extract_strided_slice %282 {offsets = [0, 32], sizes = [8, 32], strides = [1, 1]} : vector<8x128xf32> to vector<8x32xf32>
    %285 = vector.extract_strided_slice %282 {offsets = [0, 96], sizes = [8, 32], strides = [1, 1]} : vector<8x128xf32> to vector<8x32xf32>
    %286 = vector.extract_strided_slice %277 {offsets = [0, 64], sizes = [8, 32], strides = [1, 1]} : vector<8x128xf32> to vector<8x32xf32>
    %287 = math.tanh %286 : vector<8x32xf32>
    %288 = arith.mulf %284, %271 : vector<8x32xf32>
    %289 = arith.mulf %283, %287 : vector<8x32xf32>
    %290 = arith.addf %288, %289 : vector<8x32xf32>
    %291 = math.tanh %290 : vector<8x32xf32>
    %292 = arith.mulf %285, %291 : vector<8x32xf32>
    %293 = vector.extract_strided_slice %175 {offsets = [48, 0], sizes = [8, 128], strides = [1, 1]} : vector<64x128xf32> to vector<8x128xf32>
    %294 = arith.truncf %292 : vector<8x32xf32> to vector<8x32xbf16>
    %cst_55 = arith.constant dense<0.000000e+00> : vector<8x128xf32>
    %295 = tpu.matmul %294, %176, %cst_55 {dimension_numbers = #tpu.dot_dimension_numbers<[1], [0], [0], [1], [0, 0, 1, 1], [], []>} : vector<8x32xbf16>, vector<32x128xbf16>, vector<8x128xf32> -> vector<8x128xf32>
    %296 = arith.addf %293, %295 : vector<8x128xf32>
    %297 = arith.negf %296 : vector<8x128xf32>
    %298 = math.exp %297 : vector<8x128xf32>
    %cst_56 = arith.constant 1.000000e+00 : f32
    %299 = vector.broadcast %cst_56 : f32 to vector<8x128xf32>
    %300 = arith.addf %299, %298 : vector<8x128xf32>
    %301 = arith.divf %299, %300 : vector<8x128xf32>
    %302 = vector.extract_strided_slice %301 {offsets = [0, 0], sizes = [8, 32], strides = [1, 1]} : vector<8x128xf32> to vector<8x32xf32>
    %303 = vector.extract_strided_slice %301 {offsets = [0, 32], sizes = [8, 32], strides = [1, 1]} : vector<8x128xf32> to vector<8x32xf32>
    %304 = vector.extract_strided_slice %301 {offsets = [0, 96], sizes = [8, 32], strides = [1, 1]} : vector<8x128xf32> to vector<8x32xf32>
    %305 = vector.extract_strided_slice %296 {offsets = [0, 64], sizes = [8, 32], strides = [1, 1]} : vector<8x128xf32> to vector<8x32xf32>
    %306 = math.tanh %305 : vector<8x32xf32>
    %307 = arith.mulf %303, %290 : vector<8x32xf32>
    %308 = arith.mulf %302, %306 : vector<8x32xf32>
    %309 = arith.addf %307, %308 : vector<8x32xf32>
    %310 = math.tanh %309 : vector<8x32xf32>
    %311 = arith.mulf %304, %310 : vector<8x32xf32>
    %312 = vector.extract_strided_slice %175 {offsets = [56, 0], sizes = [8, 128], strides = [1, 1]} : vector<64x128xf32> to vector<8x128xf32>
    %313 = arith.truncf %311 : vector<8x32xf32> to vector<8x32xbf16>
    %cst_57 = arith.constant dense<0.000000e+00> : vector<8x128xf32>
    %314 = tpu.matmul %313, %176, %cst_57 {dimension_numbers = #tpu.dot_dimension_numbers<[1], [0], [0], [1], [0, 0, 1, 1], [], []>} : vector<8x32xbf16>, vector<32x128xbf16>, vector<8x128xf32> -> vector<8x128xf32>
    %315 = arith.addf %312, %314 : vector<8x128xf32>
    %316 = arith.negf %315 : vector<8x128xf32>
    %317 = math.exp %316 : vector<8x128xf32>
    %cst_58 = arith.constant 1.000000e+00 : f32
    %318 = vector.broadcast %cst_58 : f32 to vector<8x128xf32>
    %319 = arith.addf %318, %317 : vector<8x128xf32>
    %320 = arith.divf %318, %319 : vector<8x128xf32>
    %321 = vector.extract_strided_slice %320 {offsets = [0, 0], sizes = [8, 32], strides = [1, 1]} : vector<8x128xf32> to vector<8x32xf32>
    %322 = vector.extract_strided_slice %320 {offsets = [0, 32], sizes = [8, 32], strides = [1, 1]} : vector<8x128xf32> to vector<8x32xf32>
    %323 = vector.extract_strided_slice %320 {offsets = [0, 96], sizes = [8, 32], strides = [1, 1]} : vector<8x128xf32> to vector<8x32xf32>
    %324 = vector.extract_strided_slice %315 {offsets = [0, 64], sizes = [8, 32], strides = [1, 1]} : vector<8x128xf32> to vector<8x32xf32>
    %325 = math.tanh %324 : vector<8x32xf32>
    %326 = arith.mulf %322, %309 : vector<8x32xf32>
    %327 = arith.mulf %321, %325 : vector<8x32xf32>
    %328 = arith.addf %326, %327 : vector<8x32xf32>
    %329 = math.tanh %328 : vector<8x32xf32>
    %330 = arith.mulf %323, %329 : vector<8x32xf32>
    %c16_59 = arith.constant 16 : index
    %c0_60 = arith.constant 0 : index
    %331 = vector.load %arg2[%c16_59, %c0_60] : memref<40x128xf32, #tpu.memory_space<vmem>>, vector<1x128xf32>
    %c24_61 = arith.constant 24 : index
    %c0_62 = arith.constant 0 : index
    %332 = vector.load %arg2[%c24_61, %c0_62] : memref<40x128xf32, #tpu.memory_space<vmem>>, vector<1x128xf32>
    %c32_63 = arith.constant 32 : index
    %c0_64 = arith.constant 0 : index
    %333 = vector.load %arg2[%c32_63, %c0_64] : memref<40x128xf32, #tpu.memory_space<vmem>>, vector<8x128xf32>
    %334 = arith.truncf %330 : vector<8x32xf32> to vector<8x32xbf16>
    %c128 = arith.constant 128 : index
    %c0_65 = arith.constant 0 : index
    %335 = vector.load %arg1[%c128, %c0_65] : memref<288x128xbf16, #tpu.memory_space<vmem>>, vector<32x128xbf16>
    %cst_66 = arith.constant dense<0.000000e+00> : vector<8x128xf32>
    %336 = tpu.matmul %334, %335, %cst_66 {dimension_numbers = #tpu.dot_dimension_numbers<[1], [0], [0], [1], [0, 0, 1, 1], [], []>} : vector<8x32xbf16>, vector<32x128xbf16>, vector<8x128xf32> -> vector<8x128xf32>
    %337 = vector.broadcast %331 : vector<1x128xf32> to vector<8x128xf32>
    %338 = arith.addf %336, %337 : vector<8x128xf32>
    %cst_67 = arith.constant 0.000000e+00 : f32
    %339 = vector.broadcast %cst_67 : f32 to vector<8x128xf32>
    %340 = arith.maximumf %338, %339 : vector<8x128xf32>
    %341 = arith.truncf %340 : vector<8x128xf32> to vector<8x128xbf16>
    %c160 = arith.constant 160 : index
    %c0_68 = arith.constant 0 : index
    %342 = vector.load %arg1[%c160, %c0_68] : memref<288x128xbf16, #tpu.memory_space<vmem>>, vector<128x128xbf16>
    %cst_69 = arith.constant dense<0.000000e+00> : vector<8x128xf32>
    %343 = tpu.matmul %341, %342, %cst_69 {dimension_numbers = #tpu.dot_dimension_numbers<[1], [0], [0], [1], [0, 0, 1, 1], [], []>} : vector<8x128xbf16>, vector<128x128xbf16>, vector<8x128xf32> -> vector<8x128xf32>
    %344 = vector.broadcast %332 : vector<1x128xf32> to vector<8x128xf32>
    %345 = arith.addf %343, %344 : vector<8x128xf32>
    %346 = vector.extract_strided_slice %345 {offsets = [0, 0], sizes = [8, 4], strides = [1, 1]} : vector<8x128xf32> to vector<8x4xf32>
    %347 = vector.extract_strided_slice %345 {offsets = [0, 4], sizes = [8, 4], strides = [1, 1]} : vector<8x128xf32> to vector<8x4xf32>
    %cst_70 = arith.constant dense<0xFF800000> : vector<8xf32>
    %348 = vector.multi_reduction <maximumf>, %346, %cst_70 [1] : vector<8x4xf32> to vector<8xf32>
    %349 = vector.shape_cast %348 : vector<8xf32> to vector<8x1xf32>
    %350 = vector.broadcast %349 : vector<8x1xf32> to vector<8x4xf32>
    %351 = arith.subf %346, %350 : vector<8x4xf32>
    %352 = math.exp %351 : vector<8x4xf32>
    %cst_71 = arith.constant dense<0.000000e+00> : vector<8xf32>
    %353 = vector.multi_reduction <add>, %352, %cst_71 [1] : vector<8x4xf32> to vector<8xf32>
    %354 = vector.shape_cast %353 : vector<8xf32> to vector<8x1xf32>
    %355 = tpu.reciprocal %354 {approx = true} : vector<8x1xf32> -> vector<8x1xf32>
    %356 = vector.broadcast %355 : vector<8x1xf32> to vector<8x4xf32>
    %357 = arith.mulf %352, %356 : vector<8x4xf32>
    %358 = arith.negf %347 : vector<8x4xf32>
    %359 = math.exp %358 : vector<8x4xf32>
    %cst_72 = arith.constant 1.000000e+00 : f32
    %360 = vector.broadcast %cst_72 : f32 to vector<8x4xf32>
    %361 = arith.addf %360, %359 : vector<8x4xf32>
    %362 = arith.divf %360, %361 : vector<8x4xf32>
    %363 = vector.extract_strided_slice %333 {offsets = [0, 0], sizes = [8, 4], strides = [1, 1]} : vector<8x128xf32> to vector<8x4xf32>
    %364 = arith.mulf %362, %363 : vector<8x4xf32>
    %365 = arith.addf %357, %364 : vector<8x4xf32>
    %cst_73 = arith.constant dense<0xFF800000> : vector<8xf32>
    %366 = vector.multi_reduction <maximumf>, %365, %cst_73 [1] : vector<8x4xf32> to vector<8xf32>
    %367 = vector.shape_cast %366 : vector<8xf32> to vector<8x1xf32>
    %368 = vector.broadcast %367 : vector<8x1xf32> to vector<8x4xf32>
    %369 = arith.subf %365, %368 : vector<8x4xf32>
    %370 = math.exp %369 : vector<8x4xf32>
    %cst_74 = arith.constant dense<0.000000e+00> : vector<8xf32>
    %371 = vector.multi_reduction <add>, %370, %cst_74 [1] : vector<8x4xf32> to vector<8xf32>
    %372 = vector.shape_cast %371 : vector<8xf32> to vector<8x1xf32>
    %373 = tpu.reciprocal %372 {approx = true} : vector<8x1xf32> -> vector<8x1xf32>
    %374 = vector.broadcast %373 : vector<8x1xf32> to vector<8x4xf32>
    %375 = arith.mulf %370, %374 : vector<8x4xf32>
    %376 = arith.subf %375, %357 : vector<8x4xf32>
    %377 = arith.mulf %376, %376 : vector<8x4xf32>
    %cst_75 = arith.constant -5.000000e-01 : f32
    %378 = vector.broadcast %cst_75 : f32 to vector<8x4xf32>
    %379 = arith.mulf %378, %377 : vector<8x4xf32>
    %380 = arith.mulf %362, %362 : vector<8x4xf32>
    %381 = arith.divf %379, %380 : vector<8x4xf32>
    %382 = math.log %362 : vector<8x4xf32>
    %383 = arith.subf %381, %382 : vector<8x4xf32>
    %cst_76 = arith.constant 0.918938517 : f32
    %384 = vector.broadcast %cst_76 : f32 to vector<8x4xf32>
    %385 = arith.subf %383, %384 : vector<8x4xf32>
    %386 = tpu.concatenate %375, %385 in 1 : vector<8x4xf32>, vector<8x4xf32> -> vector<8x8xf32>
    %c0_77 = arith.constant 0 : index
    %c0_78 = arith.constant 0 : index
    %387 = vector.load %arg3[%c0_77, %c0_78] : memref<8x8xf32, #tpu.memory_space<vmem>>, vector<8x8xf32>
    tpu.vector_store %arg3[%c0_77, %c0_78], %386 {strides = array<i32>} : memref<8x8xf32, #tpu.memory_space<vmem>>, vector<8x8xf32>,
    return
  }
}

</mosaic_0001>

<bundles_post_ra>
// kernel: tpu_custom_call.1
= control target key start
LH: loop header
LB: loop body
LE: loop exit
PB: predicated region body
PF: predicated region fallthrough
CT: control target
= control target key end

     0   :  { %8 = vsyncpa [#allocation4], 0  ;;  %s2656_s0 = inlined_call_operand.vmem [shape: bf16[64,32], index: 0, kind: input, shape index: {}]   ;;  %s2657_s1 = inlined_call_operand.hbm [shape: bf16[288,128], index: 1, kind: input, shape index: {}]   ;;  %s2658_s2 = inlined_call_operand.vmem [shape: f32[40,128], index: 2, kind: input, shape index: {}]   ;;  %s2659_s3 = inlined_call_operand.hbm [shape: f32[8,8], index: 3, kind: output, shape index: {}]  }
   0x1   :  { %9 = vsyncpa [#allocation5], 0  ;;  %s2277_s12 = smov [#allocation3]  }
   0x2   :  { %s17_s13 = sshll.u32 %s2277_s12, 4  ;;  %s18_s13 = int_to_ptr.vmem [resolvable:$true] %s17_s13 }
   0x3   :  { %s2241_s14 = scalar_lea.vmem %s18_s13, 2304  ;;  %p2246_p1 = scmp.lt.s32.totalorder %s18_s13, %s18_s13 }
   0x4   :  { %p2242_p0 = scmp.ne.s32.totalorder %s18_s13, %s2241_s14  ;;  %p2247_p2 = scmp.lt.s32.totalorder %s2241_s14, %s2241_s14 }
   0x6   :  { %p2248_p3 = por %p2247_p2, %p2246_p1 }
   0x8   :  { %p2249_p4 = pnand %p2248_p3, %p2242_p0 }
   0xa   :  { %2252 = shalt.err (!%p2249_p4)
}
   0xb   :  { %s2278_s15 = smov 64   ;;  %s2279_s16 = smov 4  }
   0xc   :  { %23 = dma.hbm_to_vmem [thread:$0]  %s2657_s1, 2304, %s18_s13, [#allocation4], %s2278_s15, %s2278_s15, %s2279_s16  }
   0xd   :  { %2273 = dma.done.wait [#allocation4], 2304  }
   0xe   :  { %2274 = vsyncadd [#allocation4], 4294964992  ;;  %v2280_v0 = vmov 0.0   ;;  %vm2281_vm0 = vmmov 0   ;;  %v2067_v1 = vld [vmem:[#allocation3 + $0x8] sm:$0xff]   ;;  %v2068_v2 = vld [vmem:[#allocation3] sm:$0xff]  }
   0xf   :  { %1898 = vmatprep.subr.bf16.mxu1 %v2280_v0  ;;  %1902 = vmatprep.mubr.msk.bf16.mxu1 %vm2281_vm0, %v2280_v0  ;;  %vm79_vm1 = vcmask 261120   ;;  %v2069_v3 = vld [vmem:[%s2656_s0] sm:$0xff]   ;;  %v2319_v4 = vld [vmem:[#allocation3 + $0x18] sm:$0xff]   ;;  %v2070_v5 = vld [vmem:[%s2656_s0 + $0x8] sm:$0xff]   ;;  %v2282_v9 = vmov 0   ;;  %s2283_s27 = smov 32  }
  0x10   :  { %1878 = vmatprep.subr.bf16.mxu0 %v2067_v1  ;;  %1882 = vmatprep.mubr.msk.bf16.mxu0 %vm79_vm1, %v2069_v3  ;;  %v2072_v6 = vld [vmem:[%s2656_s0 + $0x10] sm:$0xff]   ;;  %v2073_v8 = vld [vmem:[%s2656_s0 + $0x18] sm:$0xff]   ;;  %v1739_v10 = vld [vmem:[%s2658_s2] ss:$0 sm:$0xff]  ;;  %vm1660_vm2 = vcmask 31744   ;;  %s2284_s9 = smov 124  }
  0x11   :  { %1879 = vmatpush3.bf16.msra.mxu0 %v2067_v1  ;;  %1899 = vmatpush3.bf16.msra.mxu1 %v2319_v4  ;;  %v2328_v7 = vld [vmem:[#allocation3 + $0x10] sm:$0xff]   ;;  %vm1722_vm3 = vcmask 64512  }
  0x12   :  { %1880 = vmatprep.subr.bf16.mxu0 %v2068_v2  ;;  %1900 = vmatprep.subr.bf16.mxu1 %v2280_v0 }
  0x15   :  { %1881 = vmatpush3.bf16.msra.mxu0 %v2068_v2  ;;  %1901 = vmatpush3.bf16.msra.mxu1 %v2328_v7 }
  0x16   :  { %1890 = vmatprep.subr.bf16.mxu0 %v2280_v0  ;;  %1914 = vmatprep.subr.bf16.mxu1 %v2280_v0 }
  0x18   :  { %1883 = vmatmul.mubr.msk.bf16.vlgmr.msra.gmra.mxu0 %vm79_vm1, %v2070_v5 }
  0x19   :  { %1891 = vmatpush3.bf16.msra.mxu0 %v2319_v4  ;;  %1886 = vmatprep.mubr.msk.bf16.mxu0 %vm79_vm1, %v2072_v6 }
  0x1a   :  { %1892 = vmatprep.subr.bf16.mxu0 %v2280_v0 }
  0x1d   :  { %1893 = vmatpush3.bf16.msra.mxu0 %v2328_v7 }
  0x1e   :  { %1906 = vmatprep.subr.bf16.mxu0 %v2280_v0 }
  0x20   :  { %1887 = vmatmul.mubr.msk.bf16.gmra.mxu0 %vm79_vm1, %v2073_v8 }
  0x21   :  { %1894 = vmatprep.mubr.msk.bf16.mxu0 %vm2281_vm0, %v2280_v0 }
  0x28   :  { %1895 = vmatmul.mubr.bf16.vlgmr.msra.gmra.mxu0 %v2282_v9 }
  0x29   :  { %1907 = vmatpush3.bf16.msra.mxu0 %v2319_v4  ;;  %1910 = vmatprep.mubr.msk.bf16.mxu0 %vm2281_vm0, %v2280_v0 }
  0x2a   :  { %1908 = vmatprep.subr.bf16.mxu0 %v2280_v0 }
  0x2d   :  { %1909 = vmatpush3.bf16.msra.mxu0 %v2328_v7 }
  0x2e   :  { %1922 = vmatprep.subr.bf16.mxu0 %v2280_v0 }
  0xd8   :  { %v1884_v11 = vpop.f32.mrf.mxu0 }
  0xd9   :  { %v2356_v12 = vadd.f32 %v1884_v11, %v1739_v10 }
  0xda   :  { %v126_v13 = vpop.f32.mrf.mxu0 }
  0xdb   :  { %v127_v25 = vadd.f32 %v1739_v10, %v126_v13 }
  0xdc   :  { %v1885_v14 = vpop.f32.mrf.mxu0 }
  0xdd   :  { %v2358_v15 = vadd.f32 %v1885_v14, %v1739_v10 }
  0xde   :  { %v129_v16 = vpop.f32.mrf.mxu0 }
  0xdf   :  { %v130_v17 = vadd.f32 %v1739_v10, %v129_v16 }
  0xe0   :  { %v1888_v18 = vpop.f32.mrf.mxu0 }
  0xe1   :  { %v2360_v19 = vadd.f32 %v1888_v18, %v1739_v10 }
  0xe2   :  { %v142_v20 = vpop.f32.mrf.mxu0 }
  0xe3   :  { %v2362_v21 = vadd.f32 %v1739_v10, %v142_v20 }
  0xe4   :  { %v1889_v22 = vpop.f32.mrf.mxu0 }
  0xe5   :  { %v2364_v23 = vadd.f32 %v1889_v22, %v1739_v10 }
  0xe6   :  { %v145_v24 = vpop.f32.mrf.mxu0 }
  0xe7   :  { %v2366_v26 = vadd.f32 %v1739_v10, %v145_v24 }
  0xe8   :  { %v210_v27 = vpop.f32.mrf.mxu0 }
  0xe9   :  { %v216_v28 = vadd.f32 %v210_v27, %v127_v25 }
  0xea   :  { %v1896_v29 = vpop.f32.mrf.mxu0 }
  0xeb   :  { %2089 = vtanh.f32 %v216_v28  ;;  %v1752_v33 = vmul.f32 -1.442695, %v216_v28 }
  0xec   :  { %v213_v30 = vpop.f32.mrf.mxu0 }
  0xed   :  { %2091 = vpow2.f32 %v1752_v33 }
  0xee   :  { %v1897_v31 = vpop.f32.mrf.mxu0 }
  0xf8   :  { %v2090_v32 = vpop.eup %2089 }
  0xf9   :  { %226 = vrot.lane.b32.xlu0 %v2090_v32, %s2278_s15 }
  0xfa   :  { %v2092_v34 = vpop.eup %2091 }
  0xfb   :  { %v220_v35 = vadd.f32 1.0, %v2092_v34 }
  0xfd   :  { %2093 = vrcp.f32 %v220_v35 }
 0x10a   :  { %v2094_v36 = vpop.eup %2093 }
 0x10b   :  { %v224_v39 = vmul.f32 0.0, %v2094_v36 }
 0x16b   :  { %v227_v37 = vpop.permute.xlu0 %226 }
 0x16c   :  { %v229_v38 = vmul.f32 %v2094_v36, %v227_v37 }
 0x16e   :  { %231 = vrot.lane.b32.xlu0 %v229_v38, %s2283_s27 }
 0x1e0   :  { %v232_v40 = vpop.permute.xlu0 %231 }
 0x1e1   :  { %v234_v41 = vadd.f32 %v232_v40, %v224_v39 }
 0x1e3   :  { %2095 = vtanh.f32 %v234_v41 }
 0x1f0   :  { %v2096_v42 = vpop.eup %2095 }
 0x1f1   :  { %237 = vrot.lane.b32.xlu1 %v2096_v42, %s2278_s15 }
 0x263   :  { %v238_v43 = vpop.permute.xlu1 %237 }
 0x264   :  { %v2371_v44 = vmul.f32 %v2094_v36, %v238_v43 }
 0x266   :  { %v246_v45 = vpack.c.bf16 %v2371_v44, %v2371_v44 }
 0x268   :  { %248 = vrot.lane.b32.xlu1 %v246_v45, %s2283_s27 }
 0x2da   :  { %v249_v46 = vpop.permute.xlu1 %248 }
 0x2db   :  { %1903 = vmatmul.mubr.msk.bf16.vlgmr.msra.gmra.mxu1 %vm79_vm1, %v249_v46 }
 0x2dc   :  { %1915 = vmatpush3.bf16.msra.mxu1 %v2319_v4  ;;  %1918 = vmatprep.mubr.msk.bf16.mxu1 %vm2281_vm0, %v2280_v0 }
 0x2dd   :  { %1916 = vmatprep.subr.bf16.mxu1 %v2280_v0 }
 0x2e0   :  { %1917 = vmatpush3.bf16.msra.mxu1 %v2328_v7 }
 0x2e1   :  { %1930 = vmatprep.subr.bf16.mxu1 %v2280_v0 }
 0x39b   :  { %v287_v47 = vpop.f32.mrf.mxu1 }
 0x39c   :  { %v293_v48 = vadd.f32 %v287_v47, %v130_v17 }
 0x39d   :  { %v1904_v49 = vpop.f32.mrf.mxu1 }
 0x39e   :  { %2097 = vtanh.f32 %v293_v48  ;;  %v1754_v53 = vmul.f32 -1.442695, %v293_v48 }
 0x39f   :  { %v290_v50 = vpop.f32.mrf.mxu1 }
 0x3a0   :  { %2099 = vpow2.f32 %v1754_v53 }
 0x3a1   :  { %v1905_v51 = vpop.f32.mrf.mxu1 }
 0x3ab   :  { %v2098_v52 = vpop.eup %2097 }
 0x3ac   :  { %303 = vrot.lane.b32.xlu0 %v2098_v52, %s2278_s15 }
 0x3ad   :  { %v2100_v54 = vpop.eup %2099 }
 0x3ae   :  { %v297_v55 = vadd.f32 1.0, %v2100_v54 }
 0x3b0   :  { %2101 = vrcp.f32 %v297_v55 }
 0x3bd   :  { %v2102_v56 = vpop.eup %2101 }
 0x3be   :  { %v301_v59 = vmul.f32 %v2102_v56, %v234_v41 }
 0x41e   :  { %v304_v57 = vpop.permute.xlu0 %303 }
 0x41f   :  { %v306_v58 = vmul.f32 %v2102_v56, %v304_v57 }
 0x421   :  { %308 = vrot.lane.b32.xlu1 %v306_v58, %s2283_s27 }
 0x493   :  { %v309_v60 = vpop.permute.xlu1 %308 }
 0x494   :  { %v311_v61 = vadd.f32 %v309_v60, %v301_v59 }
 0x496   :  { %2103 = vtanh.f32 %v311_v61 }
 0x4a3   :  { %v2104_v62 = vpop.eup %2103 }
 0x4a4   :  { %314 = vrot.lane.b32.xlu0 %v2104_v62, %s2278_s15 }
 0x516   :  { %v315_v63 = vpop.permute.xlu0 %314 }
 0x517   :  { %v2386_v1 = vmul.f32 %v2102_v56, %v315_v63 }
 0x519   :  { %v323_v2 = vpack.c.bf16 %v2386_v1, %v2386_v1 }
 0x51b   :  { %325 = vrot.lane.b32.xlu1 %v323_v2, %s2283_s27 }
 0x58d   :  { %v326_v3 = vpop.permute.xlu1 %325 }
 0x58e   :  { %1911 = vmatmul.mubr.msk.bf16.vlgmr.msra.gmra.mxu0 %vm79_vm1, %v326_v3 }
 0x58f   :  { %1923 = vmatpush3.bf16.msra.mxu0 %v2319_v4  ;;  %1926 = vmatprep.mubr.msk.bf16.mxu0 %vm2281_vm0, %v2280_v0 }
 0x590   :  { %1924 = vmatprep.subr.bf16.mxu0 %v2280_v0 }
 0x593   :  { %1925 = vmatpush3.bf16.msra.mxu0 %v2328_v7 }
 0x594   :  { %1938 = vmatprep.subr.bf16.mxu0 %v2280_v0 }
 0x64e   :  { %v364_v5 = vpop.f32.mrf.mxu0 }
 0x64f   :  { %v370_v6 = vadd.f32 %v364_v5, %v2356_v12 }
 0x650   :  { %v1912_v8 = vpop.f32.mrf.mxu0 }
 0x651   :  { %2105 = vtanh.f32 %v370_v6  ;;  %v1756_v14 = vmul.f32 -1.442695, %v370_v6 }
 0x652   :  { %v367_v10 = vpop.f32.mrf.mxu0 }
 0x653   :  { %2107 = vpow2.f32 %v1756_v14 }
 0x654   :  { %v1913_v11 = vpop.f32.mrf.mxu0 }
 0x65e   :  { %v2106_v13 = vpop.eup %2105 }
 0x65f   :  { %380 = vrot.lane.b32.xlu0 %v2106_v13, %s2278_s15 }
 0x660   :  { %v2108_v16 = vpop.eup %2107 }
 0x661   :  { %v374_v17 = vadd.f32 1.0, %v2108_v16 }
 0x663   :  { %2109 = vrcp.f32 %v374_v17 }
 0x670   :  { %v2110_v18 = vpop.eup %2109 }
 0x671   :  { %v378_v24 = vmul.f32 %v2110_v18, %v311_v61 }
 0x6d1   :  { %v381_v20 = vpop.permute.xlu0 %380 }
 0x6d2   :  { %v383_v22 = vmul.f32 %v2110_v18, %v381_v20 }
 0x6d4   :  { %385 = vrot.lane.b32.xlu1 %v383_v22, %s2283_s27 }
 0x746   :  { %v386_v25 = vpop.permute.xlu1 %385 }
 0x747   :  { %v388_v12 = vadd.f32 %v386_v25, %v378_v24 }
 0x749   :  { %2111 = vtanh.f32 %v388_v12 }
 0x756   :  { %v2112_v27 = vpop.eup %2111 }
 0x757   :  { %391 = vrot.lane.b32.xlu0 %v2112_v27, %s2278_s15 }
 0x7c9   :  { %v392_v28 = vpop.permute.xlu0 %391 }
 0x7ca   :  { %v2402_v29 = vmul.f32 %v2110_v18, %v392_v28 }
 0x7cc   :  { %v400_v30 = vpack.c.bf16 %v2402_v29, %v2402_v29 }
 0x7ce   :  { %402 = vrot.lane.b32.xlu1 %v400_v30, %s2283_s27 }
 0x840   :  { %v403_v31 = vpop.permute.xlu1 %402 }
 0x841   :  { %1919 = vmatmul.mubr.msk.bf16.vlgmr.msra.gmra.mxu1 %vm79_vm1, %v403_v31 }
 0x842   :  { %1931 = vmatpush3.bf16.msra.mxu1 %v2319_v4  ;;  %1934 = vmatprep.mubr.msk.bf16.mxu1 %vm2281_vm0, %v2280_v0 }
 0x843   :  { %1932 = vmatprep.subr.bf16.mxu1 %v2280_v0 }
 0x846   :  { %1933 = vmatpush3.bf16.msra.mxu1 %v2328_v7 }
 0x847   :  { %1946 = vmatprep.subr.bf16.mxu1 %v2280_v0 }
 0x901   :  { %v441_v32 = vpop.f32.mrf.mxu1 }
 0x902   :  { %v447_v33 = vadd.f32 %v441_v32, %v2358_v15 }
 0x903   :  { %v1920_v34 = vpop.f32.mrf.mxu1 }
 0x904   :  { %2113 = vtanh.f32 %v447_v33  ;;  %v1758_v38 = vmul.f32 -1.442695, %v447_v33 }
 0x905   :  { %v444_v35 = vpop.f32.mrf.mxu1 }
 0x906   :  { %2115 = vpow2.f32 %v1758_v38 }
 0x907   :  { %v1921_v36 = vpop.f32.mrf.mxu1 }
 0x911   :  { %v2114_v37 = vpop.eup %2113 }
 0x912   :  { %457 = vrot.lane.b32.xlu0 %v2114_v37, %s2278_s15 }
 0x913   :  { %v2116_v39 = vpop.eup %2115 }
 0x914   :  { %v451_v40 = vadd.f32 1.0, %v2116_v39 }
 0x916   :  { %2117 = vrcp.f32 %v451_v40 }
 0x923   :  { %v2118_v41 = vpop.eup %2117 }
 0x924   :  { %v455_v45 = vmul.f32 %v2118_v41, %v388_v12 }
 0x984   :  { %v458_v42 = vpop.permute.xlu0 %457 }
 0x985   :  { %v460_v43 = vmul.f32 %v2118_v41, %v458_v42 }
 0x987   :  { %462 = vrot.lane.b32.xlu1 %v460_v43, %s2283_s27 }
 0x9f9   :  { %v463_v46 = vpop.permute.xlu1 %462 }
 0x9fa   :  { %v465_v15 = vadd.f32 %v463_v46, %v455_v45 }
 0x9fc   :  { %2119 = vtanh.f32 %v465_v15 }
 0xa09   :  { %v2120_v47 = vpop.eup %2119 }
 0xa0a   :  { %468 = vrot.lane.b32.xlu0 %v2120_v47, %s2278_s15 }
 0xa7c   :  { %v469_v48 = vpop.permute.xlu0 %468 }
 0xa7d   :  { %v2418_v49 = vmul.f32 %v2118_v41, %v469_v48 }
 0xa7f   :  { %v477_v50 = vpack.c.bf16 %v2418_v49, %v2418_v49 }
 0xa81   :  { %479 = vrot.lane.b32.xlu1 %v477_v50, %s2283_s27 }
 0xaf3   :  { %v480_v51 = vpop.permute.xlu1 %479 }
 0xaf4   :  { %1927 = vmatmul.mubr.msk.bf16.vlgmr.msra.gmra.mxu0 %vm79_vm1, %v480_v51 }
 0xaf5   :  { %1939 = vmatpush3.bf16.msra.mxu0 %v2319_v4  ;;  %1942 = vmatprep.mubr.msk.bf16.mxu0 %vm2281_vm0, %v2280_v0 }
 0xaf6   :  { %1940 = vmatprep.subr.bf16.mxu0 %v2280_v0 }
 0xaf9   :  { %1941 = vmatpush3.bf16.msra.mxu0 %v2328_v7 }
 0xbb4   :  { %v518_v52 = vpop.f32.mrf.mxu0 }
 0xbb5   :  { %v524_v53 = vadd.f32 %v518_v52, %v2362_v21  ;;  %v2075_v52 = vld [vmem:[#allocation3 + $0x28] sm:$0xff]  }
 0xbb6   :  { %v1928_v54 = vpop.f32.mrf.mxu0  ;;  %1954 = vmatprep.subr.bf16.mxu0 %v2075_v52 }
 0xbb7   :  { %2121 = vtanh.f32 %v524_v53  ;;  %v1760_v58 = vmul.f32 -1.442695, %v524_v53  ;;  %v2076_v53 = vld [vmem:[#allocation3 + $0x20] sm:$0xff]  }
 0xbb8   :  { %v521_v55 = vpop.f32.mrf.mxu0 }
 0xbb9   :  { %2123 = vpow2.f32 %v1760_v58 }
 0xbba   :  { %v1929_v56 = vpop.f32.mrf.mxu0 }
 0xbc4   :  { %v2122_v57 = vpop.eup %2121 }
 0xbc5   :  { %534 = vrot.lane.b32.xlu0 %v2122_v57, %s2278_s15 }
 0xbc6   :  { %v2124_v59 = vpop.eup %2123 }
 0xbc7   :  { %v528_v60 = vadd.f32 1.0, %v2124_v59 }
 0xbc9   :  { %2125 = vrcp.f32 %v528_v60 }
 0xbd6   :  { %v2126_v61 = vpop.eup %2125 }
 0xbd7   :  { %v532_v2 = vmul.f32 %v2126_v61, %v465_v15 }
 0xc37   :  { %v535_v62 = vpop.permute.xlu0 %534 }
 0xc38   :  { %v537_v63 = vmul.f32 %v2126_v61, %v535_v62  ;;  %v2481_v62 = vld [vmem:[#allocation3 + $0x38] sm:$0xff]  }
 0xc3a   :  { %539 = vrot.lane.b32.xlu1 %v537_v63, %s2283_s27  ;;  %v2486_v63 = vld [vmem:[#allocation3 + $0x30] sm:$0xff]  }
 0xcac   :  { %v540_v3 = vpop.permute.xlu1 %539 }
 0xcad   :  { %v542_v21 = vadd.f32 %v540_v3, %v532_v2 }
 0xcaf   :  { %2127 = vtanh.f32 %v542_v21 }
 0xcbc   :  { %v2128_v5 = vpop.eup %2127 }
 0xcbd   :  { %545 = vrot.lane.b32.xlu0 %v2128_v5, %s2278_s15 }
 0xd2f   :  { %v546_v6 = vpop.permute.xlu0 %545 }
 0xd30   :  { %v2433_v8 = vmul.f32 %v2126_v61, %v546_v6 }
 0xd32   :  { %v554_v10 = vpack.c.bf16 %v2433_v8, %v2433_v8 }
 0xd34   :  { %556 = vrot.lane.b32.xlu1 %v554_v10, %s2283_s27 }
 0xda6   :  { %v557_v11 = vpop.permute.xlu1 %556 }
 0xda7   :  { %1935 = vmatmul.mubr.msk.bf16.vlgmr.msra.gmra.mxu1 %vm79_vm1, %v557_v11 }
 0xda8   :  { %1947 = vmatpush3.bf16.msra.mxu1 %v2319_v4  ;;  %1950 = vmatprep.mubr.msk.bf16.mxu1 %vm2281_vm0, %v2280_v0 }
 0xda9   :  { %1948 = vmatprep.subr.bf16.mxu1 %v2280_v0 }
 0xdac   :  { %1949 = vmatpush3.bf16.msra.mxu1 %v2328_v7 }
 0xdad   :  { %1966 = vmatprep.subr.bf16.mxu1 %v2280_v0 }
 0xe67   :  { %v595_v13 = vpop.f32.mrf.mxu1 }
 0xe68   :  { %v601_v14 = vadd.f32 %v595_v13, %v2366_v26 }
 0xe69   :  { %v1936_v16 = vpop.f32.mrf.mxu1 }
 0xe6a   :  { %2129 = vtanh.f32 %v601_v14  ;;  %v1762_v4 = vmul.f32 -1.442695, %v601_v14 }
 0xe6b   :  { %v598_v17 = vpop.f32.mrf.mxu1 }
 0xe6c   :  { %2131 = vpow2.f32 %v1762_v4 }
 0xe6d   :  { %v1937_v18 = vpop.f32.mrf.mxu1 }
 0xe77   :  { %v2130_v20 = vpop.eup %2129 }
 0xe78   :  { %611 = vrot.lane.b32.xlu0 %v2130_v20, %s2278_s15 }
 0xe79   :  { %v2132_v22 = vpop.eup %2131 }
 0xe7a   :  { %v605_v24 = vadd.f32 1.0, %v2132_v22 }
 0xe7c   :  { %2133 = vrcp.f32 %v605_v24 }
 0xe89   :  { %v2134_v25 = vpop.eup %2133 }
 0xe8a   :  { %v609_v27 = vmul.f32 %v2134_v25, %v542_v21 }
 0xeea   :  { %v612_v12 = vpop.permute.xlu0 %611 }
 0xeeb   :  { %v614_v7 = vmul.f32 %v2134_v25, %v612_v12 }
 0xeed   :  { %616 = vrot.lane.b32.xlu1 %v614_v7, %s2283_s27 }
 0xf5f   :  { %v617_v28 = vpop.permute.xlu1 %616 }
 0xf60   :  { %v619_v26 = vadd.f32 %v617_v28, %v609_v27 }
 0xf62   :  { %2135 = vtanh.f32 %v619_v26 }
 0xf6f   :  { %v2136_v30 = vpop.eup %2135 }
 0xf70   :  { %622 = vrot.lane.b32.xlu0 %v2136_v30, %s2278_s15 }
 0xfe2   :  { %v623_v31 = vpop.permute.xlu0 %622 }
 0xfe3   :  { %v2449_v32 = vmul.f32 %v2134_v25, %v623_v31 }
 0xfe5   :  { %v631_v33 = vpack.c.bf16 %v2449_v32, %v2449_v32 }
 0xfe7   :  { %633 = vrot.lane.b32.xlu1 %v631_v33, %s2283_s27 }
0x1059   :  { %v634_v34 = vpop.permute.xlu1 %633 }
0x105a   :  { %1943 = vmatmul.mubr.msk.bf16.vlgmr.msra.gmra.mxu0 %vm79_vm1, %v634_v34 }
0x105b   :  { %1955 = vmatpush3.bf16.msra.mxu0 %v2075_v52 }
0x105c   :  { %1956 = vmatprep.subr.bf16.mxu0 %v2076_v53 }
0x105f   :  { %1957 = vmatpush3.bf16.msra.mxu0 %v2076_v53 }
0x1060   :  { %1982 = vmatprep.subr.bf16.mxu0 %v2280_v0 }
0x111a   :  { %v672_v35 = vpop.f32.mrf.mxu0 }
0x111b   :  { %v678_v36 = vadd.f32 %v672_v35, %v2360_v19 }
0x111c   :  { %v1944_v37 = vpop.f32.mrf.mxu0 }
0x111d   :  { %2137 = vtanh.f32 %v678_v36  ;;  %v1764_v41 = vmul.f32 -1.442695, %v678_v36 }
0x111e   :  { %v675_v38 = vpop.f32.mrf.mxu0 }
0x111f   :  { %2139 = vpow2.f32 %v1764_v41 }
0x1120   :  { %v1945_v39 = vpop.f32.mrf.mxu0 }
0x112a   :  { %v2138_v40 = vpop.eup %2137 }
0x112b   :  { %688 = vrot.lane.b32.xlu0 %v2138_v40, %s2278_s15 }
0x112c   :  { %v2140_v42 = vpop.eup %2139 }
0x112d   :  { %v682_v43 = vadd.f32 1.0, %v2140_v42 }
0x112f   :  { %2141 = vrcp.f32 %v682_v43 }
0x113c   :  { %v2142_v45 = vpop.eup %2141 }
0x113d   :  { %v686_v19 = vmul.f32 %v2142_v45, %v619_v26 }
0x119d   :  { %v689_v46 = vpop.permute.xlu0 %688 }
0x119e   :  { %v691_v15 = vmul.f32 %v2142_v45, %v689_v46 }
0x11a0   :  { %693 = vrot.lane.b32.xlu1 %v691_v15, %s2283_s27 }
0x11a4   :  { %242 = vrot.lane.b32.xlu1 %v2371_v44, %s2283_s27 }
0x11a8   :  { %396 = vrot.lane.b32.xlu1 %v2402_v29, %s2283_s27 }
0x1212   :  { %v694_v47 = vpop.permute.xlu1 %693 }
0x1213   :  { %v2462_v48 = vadd.f32 %v694_v47, %v686_v19 }
0x1215   :  { %2143 = vtanh.f32 %v2462_v48 }
0x1216   :  { %v243_v50 = vpop.permute.xlu1 %242 }
0x1217   :  { %245 = vst.msk [vmem:[#allocation2] sm:$0xff] %vm79_vm1, %v243_v50 }
0x121a   :  { %v397_v51 = vpop.permute.xlu1 %396 }
0x121b   :  { %399 = vst.msk [vmem:[#allocation2 + $0x10] sm:$0xff] %vm79_vm1, %v397_v51 }
0x121e   :  { %v785_v58 = vld [vmem:[#allocation2] sm:$0xff] }
0x1222   :  { %v2144_v44 = vpop.eup %2143 }
0x1223   :  { %699 = vrot.lane.b32.xlu0 %v2144_v44, %s2278_s15 }
0x1227   :  { %319 = vrot.lane.b32.xlu0 %v2386_v1, %s2283_s27 }
0x122b   :  { %473 = vrot.lane.b32.xlu0 %v2418_v49, %s2283_s27  ;;  %v787_v49 = vld [vmem:[#allocation2 + $0x10] sm:$0xff] }
0x1295   :  { %v700_v29 = vpop.permute.xlu0 %699 }
0x1296   :  { %v2473_v54 = vmul.f32 %v2142_v45, %v700_v29 }
0x1298   :  { %v708_v55 = vpack.c.bf16 %v2473_v54, %v2473_v54 }
0x1299   :  { %v320_v56 = vpop.permute.xlu0 %319 }
0x129a   :  { %322 = vst.msk [vmem:[#allocation2 + $0x8] sm:$0xff] %vm79_vm1, %v320_v56  ;;  %710 = vrot.lane.b32.xlu1 %v708_v55, %s2283_s27 }
0x129d   :  { %v474_v57 = vpop.permute.xlu0 %473 }
0x129e   :  { %476 = vst.msk [vmem:[#allocation2 + $0x18] sm:$0xff] %vm79_vm1, %v474_v57 }
0x12a1   :  { %v786_v59 = vld [vmem:[#allocation2 + $0x8] sm:$0xff] }
0x12a2   :  { %v793_v1 = vpack.c.bf16 %v786_v59, %v785_v58 }
0x12a4   :  { %1958 = vmatprep.mubr.msk.bf16.mxu0 %vm79_vm1, %v793_v1 }
0x12a5   :  { %v788_v60 = vld [vmem:[#allocation2 + $0x18] sm:$0xff] }
0x12a6   :  { %v794_v61 = vpack.c.bf16 %v788_v60, %v787_v49 }
0x12a8   :  { %1959 = vmatmul.mubr.msk.bf16.vlgmr.msra.gmra.mxu0 %vm79_vm1, %v794_v61 }
0x12a9   :  { %1983 = vmatpush3.bf16.msra.mxu0 %v2481_v62 }
0x12aa   :  { %1984 = vmatprep.subr.bf16.mxu0 %v2280_v0 }
0x12ad   :  { %1985 = vmatpush3.bf16.msra.mxu0 %v2486_v63 }
0x12ae   :  { %1998 = vmatprep.subr.bf16.mxu0 %v2280_v0 }
0x130c   :  { %v711_v2 = vpop.permute.xlu1 %710 }
0x130d   :  { %1951 = vmatmul.mubr.msk.bf16.vlgmr.msra.gmra.mxu1 %vm79_vm1, %v711_v2 }
0x130e   :  { %1967 = vmatpush3.bf16.msra.mxu1 %v2481_v62  ;;  %1970 = vmatprep.mubr.msk.bf16.mxu1 %vm2281_vm0, %v2280_v0 }
0x130f   :  { %1968 = vmatprep.subr.bf16.mxu1 %v2280_v0 }
0x1312   :  { %1969 = vmatpush3.bf16.msra.mxu1 %v2486_v63 }
0x1313   :  { %1974 = vmatprep.subr.bf16.mxu1 %v2280_v0 }
0x1315   :  { %1971 = vmatmul.mubr.bf16.vlgmr.msra.gmra.mxu1 %v2282_v9  ;;  %v2510_v9 = vld [vmem:[%s2658_s2 + $0x8] ss:$0 sm:$0xff] }
0x1316   :  { %1975 = vmatpush3.bf16.msra.mxu1 %v2481_v62  ;;  %1978 = vmatprep.mubr.msk.bf16.mxu1 %vm2281_vm0, %v2280_v0 }
0x1317   :  { %1976 = vmatprep.subr.bf16.mxu1 %v2280_v0 }
0x131a   :  { %1977 = vmatpush3.bf16.msra.mxu1 %v2486_v63 }
0x131b   :  { %1990 = vmatprep.subr.bf16.mxu1 %v2280_v0 }
0x1368   :  { %v2504_v3 = vpop.f32.mrf.mxu0 }
0x136a   :  { %v864_v10 = vpop.f32.mrf.mxu0 }
0x136b   :  { %v865_v14 = vadd.f32 %v2510_v9, %v864_v10 }
0x136c   :  { %v2534_v51 = vpop.f32.mrf.mxu0 }
0x136e   :  { %v867_v52 = vpop.f32.mrf.mxu0 }
0x136f   :  { %v868_v53 = vadd.f32 %v2510_v9, %v867_v52 }
0x13cd   :  { %v749_v21 = vpop.f32.mrf.mxu1 }
0x13ce   :  { %v755_v5 = vadd.f32 %v749_v21, %v2364_v23 }
0x13cf   :  { %v1952_v6 = vpop.f32.mrf.mxu1 }
0x13d0   :  { %v1766_v34 = vmul.f32 -1.442695, %v755_v5 }
0x13d1   :  { %v752_v11 = vpop.f32.mrf.mxu1 }
0x13d3   :  { %v1953_v13 = vpop.f32.mrf.mxu1 }
0x13d5   :  { %v945_v16 = vpop.f32.mrf.mxu1 }
0x13d6   :  { %v951_v17 = vadd.f32 %v945_v16, %v865_v14 }
0x13d7   :  { %v1972_v18 = vpop.f32.mrf.mxu1 }
0x13d8   :  { %2145 = vtanh.f32 %v951_v17  ;;  %v1776_v23 = vmul.f32 -1.442695, %v951_v17 }
0x13d9   :  { %v948_v20 = vpop.f32.mrf.mxu1 }
0x13da   :  { %2147 = vpow2.f32 %v1776_v23 }
0x13db   :  { %v1973_v4 = vpop.f32.mrf.mxu1 }
0x13e5   :  { %v2146_v22 = vpop.eup %2145 }
0x13e6   :  { %961 = vrot.lane.b32.xlu0 %v2146_v22, %s2278_s15 }
0x13e7   :  { %v2148_v24 = vpop.eup %2147 }
0x13e8   :  { %v955_v25 = vadd.f32 1.0, %v2148_v24 }
0x13ea   :  { %2149 = vrcp.f32 %v955_v25 }
0x13f7   :  { %v2150_v12 = vpop.eup %2149 }
0x13f8   :  { %v959_v28 = vmul.f32 0.0, %v2150_v12 }
0x1458   :  { %v962_v7 = vpop.permute.xlu0 %961 }
0x1459   :  { %v964_v27 = vmul.f32 %v2150_v12, %v962_v7 }
0x145b   :  { %966 = vrot.lane.b32.xlu1 %v964_v27, %s2283_s27  ;;  %v873_v27 = vadd.f32 %v2504_v3, %v2510_v9 }
0x14cd   :  { %v967_v26 = vpop.permute.xlu1 %966 }
0x14ce   :  { %v969_v30 = vadd.f32 %v967_v26, %v959_v28 }
0x14d0   :  { %2151 = vtanh.f32 %v969_v30 }
0x14d1   :  { %2153 = vtanh.f32 %v755_v5 }
0x14d2   :  { %2155 = vpow2.f32 %v1766_v34 }
0x14dd   :  { %v2152_v31 = vpop.eup %2151 }
0x14de   :  { %972 = vrot.lane.b32.xlu0 %v2152_v31, %s2278_s15  ;;  %v2154_v33 = vpop.eup %2153 }
0x14df   :  { %v2156_v35 = vpop.eup %2155 }
0x14e0   :  { %v759_v36 = vadd.f32 1.0, %v2156_v35 }
0x14e2   :  { %765 = vrot.lane.b32.xlu0 %v2154_v33, %s2278_s15  ;;  %2157 = vrcp.f32 %v759_v36 }
0x14ef   :  { %v2158_v40 = vpop.eup %2157 }
0x14f0   :  { %v763_v45 = vmul.f32 %v2158_v40, %v2462_v48 }
0x1550   :  { %v973_v37 = vpop.permute.xlu0 %972 }
0x1551   :  { %v975_v38 = vmul.f32 %v2150_v12, %v973_v37 }
0x1553   :  { %v976_v39 = vpack.c.bf16 %v975_v38, %v975_v38 }
0x1554   :  { %v766_v41 = vpop.permute.xlu0 %765 }
0x1555   :  { %v768_v42 = vmul.f32 %v2158_v40, %v766_v41  ;;  %978 = vrot.lane.b32.xlu1 %v976_v39, %s2283_s27 }
0x1557   :  { %770 = vrot.lane.b32.xlu0 %v768_v42, %s2283_s27 }
0x15c7   :  { %v979_v43 = vpop.permute.xlu1 %978 }
0x15c8   :  { %1979 = vmatmul.mubr.msk.bf16.vlgmr.msra.gmra.mxu1 %vm79_vm1, %v979_v43 }
0x15c9   :  { %v771_v46 = vpop.permute.xlu0 %770  ;;  %1991 = vmatpush3.bf16.msra.mxu1 %v2481_v62  ;;  %1994 = vmatprep.mubr.msk.bf16.mxu1 %vm2281_vm0, %v2280_v0 }
0x15ca   :  { %v773_v15 = vadd.f32 %v771_v46, %v763_v45  ;;  %1992 = vmatprep.subr.bf16.mxu1 %v2280_v0 }
0x15cc   :  { %2159 = vtanh.f32 %v773_v15 }
0x15cd   :  { %1993 = vmatpush3.bf16.msra.mxu1 %v2486_v63 }
0x15ce   :  { %2006 = vmatprep.subr.bf16.mxu1 %v2280_v0 }
0x15d9   :  { %v2160_v19 = vpop.eup %2159 }
0x15da   :  { %776 = vrot.lane.b32.xlu0 %v2160_v19, %s2278_s15 }
0x15de   :  { %550 = vrot.lane.b32.xlu0 %v2433_v8, %s2283_s27 }
0x15e2   :  { %704 = vrot.lane.b32.xlu0 %v2473_v54, %s2283_s27 }
0x164c   :  { %v777_v47 = vpop.permute.xlu0 %776 }
0x164d   :  { %v779_v6 = vmul.f32 %v2158_v40, %v777_v47  ;;  %v876_v47 = vadd.f32 %v2534_v51, %v2510_v9 }
0x1650   :  { %v551_v48 = vpop.permute.xlu0 %550 }
0x1651   :  { %553 = vst.msk [vmem:[#allocation2 + $0x20] sm:$0xff] %vm79_vm1, %v551_v48 }
0x1654   :  { %v705_v50 = vpop.permute.xlu0 %704 }
0x1655   :  { %707 = vst.msk [vmem:[#allocation2 + $0x30] sm:$0xff] %vm79_vm1, %v705_v50 }
0x1658   :  { %v789_v17 = vld [vmem:[#allocation2 + $0x20] sm:$0xff] }
0x1688   :  { %v1017_v44 = vpop.f32.mrf.mxu1 }
0x1689   :  { %v1023_v29 = vadd.f32 %v1017_v44, %v868_v53 }
0x168a   :  { %v1980_v55 = vpop.f32.mrf.mxu1 }
0x168b   :  { %2161 = vtanh.f32 %v1023_v29  ;;  %v1778_v54 = vmul.f32 -1.442695, %v1023_v29 }
0x168c   :  { %v1020_v8 = vpop.f32.mrf.mxu1 }
0x168d   :  { %2163 = vpow2.f32 %v1778_v54 }
0x168e   :  { %v1981_v56 = vpop.f32.mrf.mxu1 }
0x1698   :  { %v2162_v57 = vpop.eup %2161 }
0x1699   :  { %1033 = vrot.lane.b32.xlu1 %v2162_v57, %s2278_s15 }
0x169a   :  { %v2164_v58 = vpop.eup %2163 }
0x169b   :  { %v1027_v59 = vadd.f32 1.0, %v2164_v58 }
0x169d   :  { %2165 = vrcp.f32 %v1027_v59 }
0x16aa   :  { %v2166_v1 = vpop.eup %2165 }
0x16ab   :  { %v1031_v61 = vmul.f32 %v2166_v1, %v969_v30 }
0x170b   :  { %v1034_v49 = vpop.permute.xlu1 %1033 }
0x170c   :  { %v1036_v60 = vmul.f32 %v2166_v1, %v1034_v49 }
0x170e   :  { %1038 = vrot.lane.b32.xlu1 %v1036_v60, %s2283_s27 }
0x1780   :  { %v1039_v2 = vpop.permute.xlu1 %1038 }
0x1781   :  { %v1041_v21 = vadd.f32 %v1039_v2, %v1031_v61 }
0x1783   :  { %2167 = vtanh.f32 %v1041_v21 }
0x1790   :  { %v2168_v5 = vpop.eup %2167 }
0x1791   :  { %1044 = vrot.lane.b32.xlu1 %v2168_v5, %s2278_s15 }
0x1795   :  { %627 = vrot.lane.b32.xlu1 %v2449_v32, %s2283_s27  ;;  %v791_v32 = vld [vmem:[#allocation2 + $0x30] sm:$0xff] }
0x1799   :  { %781 = vrot.lane.b32.xlu1 %v779_v6, %s2283_s27 }
0x1803   :  { %v1045_v10 = vpop.permute.xlu1 %1044 }
0x1804   :  { %v1047_v11 = vmul.f32 %v2166_v1, %v1045_v10 }
0x1806   :  { %v1048_v13 = vpack.c.bf16 %v1047_v11, %v1047_v11 }
0x1807   :  { %v628_v14 = vpop.permute.xlu1 %627 }
0x1808   :  { %630 = vst.msk [vmem:[#allocation2 + $0x28] sm:$0xff] %vm79_vm1, %v628_v14  ;;  %1050 = vrot.lane.b32.xlu0 %v1048_v13, %s2283_s27 }
0x180b   :  { %v782_v16 = vpop.permute.xlu1 %781 }
0x180c   :  { %784 = vst.msk [vmem:[#allocation2 + $0x38] sm:$0xff] %vm79_vm1, %v782_v16 }
0x180f   :  { %v790_v18 = vld [vmem:[#allocation2 + $0x28] sm:$0xff] }
0x1810   :  { %v795_v20 = vpack.c.bf16 %v790_v18, %v789_v17 }
0x1812   :  { %1962 = vmatprep.mubr.msk.bf16.mxu0 %vm79_vm1, %v795_v20 }
0x1813   :  { %v792_v4 = vld [vmem:[#allocation2 + $0x38] sm:$0xff] }
0x1814   :  { %v796_v22 = vpack.c.bf16 %v792_v4, %v791_v32 }
0x1816   :  { %1963 = vmatmul.mubr.msk.bf16.gmra.mxu0 %vm79_vm1, %v796_v22 }
0x1817   :  { %1986 = vmatprep.mubr.msk.bf16.mxu0 %vm2281_vm0, %v2280_v0 }
0x187a   :  { %v1051_v23 = vpop.permute.xlu0 %1050 }
0x187b   :  { %1987 = vmatmul.mubr.msk.bf16.vlgmr.msra.gmra.mxu0 %vm79_vm1, %v1051_v23 }
0x187c   :  { %1999 = vmatpush3.bf16.msra.mxu0 %v2481_v62  ;;  %2002 = vmatprep.mubr.msk.bf16.mxu0 %vm2281_vm0, %v2280_v0 }
0x187d   :  { %2000 = vmatprep.subr.bf16.mxu0 %v2280_v0 }
0x1880   :  { %2001 = vmatpush3.bf16.msra.mxu0 %v2486_v63 }
0x1881   :  { %2014 = vmatprep.subr.bf16.mxu0 %v2280_v0 }
0x18d6   :  { %v2557_v24 = vpop.f32.mrf.mxu0 }
0x18d8   :  { %v2559_v25 = vpop.f32.mrf.mxu0 }
0x18d9   :  { %v881_v5 = vadd.f32 %v2510_v9, %v2559_v25 }
0x18da   :  { %v2561_v12 = vpop.f32.mrf.mxu0 }
0x18dc   :  { %v2563_v7 = vpop.f32.mrf.mxu0 }
0x193b   :  { %v1089_v28 = vpop.f32.mrf.mxu0 }
0x193c   :  { %v1095_v26 = vadd.f32 %v1089_v28, %v873_v27 }
0x193d   :  { %v1988_v30 = vpop.f32.mrf.mxu0 }
0x193e   :  { %2169 = vtanh.f32 %v1095_v26  ;;  %v1780_v35 = vmul.f32 -1.442695, %v1095_v26 }
0x193f   :  { %v1092_v31 = vpop.f32.mrf.mxu0 }
0x1940   :  { %2171 = vpow2.f32 %v1780_v35 }
0x1941   :  { %v1989_v33 = vpop.f32.mrf.mxu0 }
0x194b   :  { %v2170_v34 = vpop.eup %2169 }
0x194c   :  { %1105 = vrot.lane.b32.xlu1 %v2170_v34, %s2278_s15  ;;  %v884_v34 = vadd.f32 %v2510_v9, %v2563_v7 }
0x194d   :  { %v2172_v36 = vpop.eup %2171 }
0x194e   :  { %v1099_v37 = vadd.f32 1.0, %v2172_v36 }
0x1950   :  { %2173 = vrcp.f32 %v1099_v37 }
0x195d   :  { %v2174_v38 = vpop.eup %2173 }
0x195e   :  { %v1103_v3 = vmul.f32 %v2174_v38, %v1041_v21 }
0x19be   :  { %v1106_v39 = vpop.permute.xlu1 %1105 }
0x19bf   :  { %v1108_v40 = vmul.f32 %v2174_v38, %v1106_v39 }
0x19c1   :  { %1110 = vrot.lane.b32.xlu0 %v1108_v40, %s2283_s27 }
0x1a33   :  { %v1111_v41 = vpop.permute.xlu0 %1110 }
0x1a34   :  { %v1113_v42 = vadd.f32 %v1111_v41, %v1103_v3 }
0x1a36   :  { %2175 = vtanh.f32 %v1113_v42 }
0x1a43   :  { %v2176_v43 = vpop.eup %2175 }
0x1a44   :  { %1116 = vrot.lane.b32.xlu1 %v2176_v43, %s2278_s15 }
0x1ab6   :  { %v1117_v45 = vpop.permute.xlu1 %1116 }
0x1ab7   :  { %v1119_v46 = vmul.f32 %v2174_v38, %v1117_v45 }
0x1ab9   :  { %v1120_v15 = vpack.c.bf16 %v1119_v46, %v1119_v46 }
0x1abb   :  { %1122 = vrot.lane.b32.xlu0 %v1120_v15, %s2283_s27 }
0x1b2d   :  { %v1123_v19 = vpop.permute.xlu0 %1122 }
0x1b2e   :  { %1995 = vmatmul.mubr.msk.bf16.vlgmr.msra.gmra.mxu1 %vm79_vm1, %v1123_v19 }
0x1b2f   :  { %2007 = vmatpush3.bf16.msra.mxu1 %v2481_v62  ;;  %2010 = vmatprep.mubr.msk.bf16.mxu1 %vm2281_vm0, %v2280_v0 }
0x1b30   :  { %2008 = vmatprep.subr.bf16.mxu1 %v2280_v0 }
0x1b33   :  { %2009 = vmatpush3.bf16.msra.mxu1 %v2486_v63 }
0x1b34   :  { %2022 = vmatprep.subr.bf16.mxu1 %v2280_v0 }
0x1bee   :  { %v1161_v48 = vpop.f32.mrf.mxu1 }
0x1bef   :  { %v1167_v50 = vadd.f32 %v1161_v48, %v876_v47 }
0x1bf0   :  { %v1996_v52 = vpop.f32.mrf.mxu1 }
0x1bf1   :  { %2177 = vtanh.f32 %v1167_v50  ;;  %v1782_v55 = vmul.f32 -1.442695, %v1167_v50  ;;  %v889_v52 = vadd.f32 %v2557_v24, %v2510_v9 }
0x1bf2   :  { %v1164_v53 = vpop.f32.mrf.mxu1 }
0x1bf3   :  { %2179 = vpow2.f32 %v1782_v55 }
0x1bf4   :  { %v1997_v44 = vpop.f32.mrf.mxu1 }
0x1bfe   :  { %v2178_v29 = vpop.eup %2177 }
0x1bff   :  { %1177 = vrot.lane.b32.xlu1 %v2178_v29, %s2278_s15 }
0x1c00   :  { %v2180_v8 = vpop.eup %2179 }
0x1c01   :  { %v1171_v56 = vadd.f32 1.0, %v2180_v8 }
0x1c03   :  { %2181 = vrcp.f32 %v1171_v56 }
0x1c10   :  { %v2182_v57 = vpop.eup %2181 }
0x1c11   :  { %v1175_v51 = vmul.f32 %v2182_v57, %v1113_v42 }
0x1c71   :  { %v1178_v54 = vpop.permute.xlu1 %1177 }
0x1c72   :  { %v1180_v58 = vmul.f32 %v2182_v57, %v1178_v54 }
0x1c74   :  { %1182 = vrot.lane.b32.xlu0 %v1180_v58, %s2283_s27 }
0x1ce6   :  { %v1183_v59 = vpop.permute.xlu0 %1182 }
0x1ce7   :  { %v1185_v1 = vadd.f32 %v1183_v59, %v1175_v51 }
0x1ce9   :  { %2183 = vtanh.f32 %v1185_v1 }
0x1cf6   :  { %v2184_v49 = vpop.eup %2183 }
0x1cf7   :  { %1188 = vrot.lane.b32.xlu1 %v2184_v49, %s2278_s15 }
0x1d69   :  { %v1189_v60 = vpop.permute.xlu1 %1188 }
0x1d6a   :  { %v1191_v61 = vmul.f32 %v2182_v57, %v1189_v60 }
0x1d6c   :  { %v1192_v2 = vpack.c.bf16 %v1191_v61, %v1191_v61 }
0x1d6e   :  { %1194 = vrot.lane.b32.xlu0 %v1192_v2, %s2283_s27 }
0x1de0   :  { %v1195_v21 = vpop.permute.xlu0 %1194 }
0x1de1   :  { %2003 = vmatmul.mubr.msk.bf16.vlgmr.msra.gmra.mxu0 %vm79_vm1, %v1195_v21 }
0x1de2   :  { %2015 = vmatpush3.bf16.msra.mxu0 %v2481_v62  ;;  %2018 = vmatprep.mubr.msk.bf16.mxu0 %vm2281_vm0, %v2280_v0 }
0x1de3   :  { %2016 = vmatprep.subr.bf16.mxu0 %v2280_v0 }
0x1de6   :  { %2017 = vmatpush3.bf16.msra.mxu0 %v2486_v63 }
0x1de7   :  { %2030 = vmatprep.subr.bf16.mxu0 %v2280_v0 }
0x1ea1   :  { %v1233_v6 = vpop.f32.mrf.mxu0 }
0x1ea2   :  { %v1239_v10 = vadd.f32 %v1233_v6, %v881_v5 }
0x1ea3   :  { %v2004_v11 = vpop.f32.mrf.mxu0 }
0x1ea4   :  { %2185 = vtanh.f32 %v1239_v10  ;;  %v1784_v17 = vmul.f32 -1.442695, %v1239_v10  ;;  %v892_v10 = vadd.f32 %v2561_v12, %v2510_v9 }
0x1ea5   :  { %v1236_v13 = vpop.f32.mrf.mxu0 }
0x1ea6   :  { %2187 = vpow2.f32 %v1784_v17 }
0x1ea7   :  { %v2005_v14 = vpop.f32.mrf.mxu0 }
0x1eb1   :  { %v2186_v16 = vpop.eup %2185 }
0x1eb2   :  { %1249 = vrot.lane.b32.xlu1 %v2186_v16, %s2278_s15 }
0x1eb3   :  { %v2188_v18 = vpop.eup %2187 }
0x1eb4   :  { %v1243_v20 = vadd.f32 1.0, %v2188_v18 }
0x1eb6   :  { %2189 = vrcp.f32 %v1243_v20 }
0x1ec3   :  { %v2190_v32 = vpop.eup %2189 }
0x1ec4   :  { %v1247_v23 = vmul.f32 %v2190_v32, %v1185_v1 }
0x1f24   :  { %v1250_v4 = vpop.permute.xlu1 %1249 }
0x1f25   :  { %v1252_v22 = vmul.f32 %v2190_v32, %v1250_v4 }
0x1f27   :  { %1254 = vrot.lane.b32.xlu0 %v1252_v22, %s2283_s27 }
0x1f99   :  { %v1255_v25 = vpop.permute.xlu0 %1254 }
0x1f9a   :  { %v1257_v27 = vadd.f32 %v1255_v25, %v1247_v23 }
0x1f9c   :  { %2191 = vtanh.f32 %v1257_v27 }
0x1fa9   :  { %v2192_v28 = vpop.eup %2191 }
0x1faa   :  { %1260 = vrot.lane.b32.xlu1 %v2192_v28, %s2278_s15  ;;  %v2079_v28 = vld [vmem:[#allocation3 + $0x48] sm:$0xff]  }
0x201c   :  { %v1261_v26 = vpop.permute.xlu1 %1260 }
0x201d   :  { %v1263_v30 = vmul.f32 %v2190_v32, %v1261_v26  ;;  %v2080_v26 = vld [vmem:[#allocation3 + $0x40] sm:$0xff]  }
0x201f   :  { %v1264_v31 = vpack.c.bf16 %v1263_v30, %v1263_v30 }
0x2021   :  { %1266 = vrot.lane.b32.xlu0 %v1264_v31, %s2283_s27  ;;  %v2081_v31 = vld [vmem:[#allocation3 + $0x88] sm:$0xff]  }
0x2093   :  { %v1267_v33 = vpop.permute.xlu0 %1266 }
0x2094   :  { %2011 = vmatmul.mubr.msk.bf16.vlgmr.msra.gmra.mxu1 %vm79_vm1, %v1267_v33  ;;  %v2082_v33 = vld [vmem:[#allocation3 + $0x80] sm:$0xff]  }
0x2095   :  { %2023 = vmatpush3.bf16.msra.mxu1 %v2481_v62  ;;  %2026 = vmatprep.mubr.msk.bf16.mxu1 %vm2281_vm0, %v2280_v0 }
0x2096   :  { %2024 = vmatprep.subr.bf16.mxu1 %v2280_v0 }
0x2099   :  { %2025 = vmatpush3.bf16.msra.mxu1 %v2486_v63 }
0x209a   :  { %2038 = vmatprep.subr.bf16.mxu1 %v2280_v0 }
0x2154   :  { %v1305_v35 = vpop.f32.mrf.mxu1 }
0x2155   :  { %v1311_v36 = vadd.f32 %v1305_v35, %v884_v34  ;;  %v2083_v34 = vld [vmem:[#allocation3 + $0x78] sm:$0xff]  }
0x2156   :  { %v2012_v37 = vpop.f32.mrf.mxu1 }
0x2157   :  { %2193 = vtanh.f32 %v1311_v36  ;;  %v1786_v62 = vmul.f32 -1.442695, %v1311_v36  ;;  %v2084_v37 = vld [vmem:[#allocation3 + $0x70] sm:$0xff]  }
0x2158   :  { %v1308_v38 = vpop.f32.mrf.mxu1 }
0x2159   :  { %2195 = vpow2.f32 %v1786_v62 }
0x215a   :  { %v2013_v39 = vpop.f32.mrf.mxu1 }
0x215b   :  { %v2085_v39 = vld [vmem:[#allocation3 + $0x68] sm:$0xff]  }
0x2164   :  { %v2194_v40 = vpop.eup %2193 }
0x2165   :  { %1321 = vrot.lane.b32.xlu1 %v2194_v40, %s2278_s15  ;;  %v2086_v40 = vld [vmem:[#allocation3 + $0x60] sm:$0xff]  }
0x2166   :  { %v2196_v3 = vpop.eup %2195 }
0x2167   :  { %v1315_v41 = vadd.f32 1.0, %v2196_v3  ;;  %v2087_v3 = vld [vmem:[#allocation3 + $0x58] sm:$0xff]  }
0x2169   :  { %2197 = vrcp.f32 %v1315_v41  ;;  %v2088_v41 = vld [vmem:[#allocation3 + $0x50] sm:$0xff]  }
0x2176   :  { %v2198_v63 = vpop.eup %2197 }
0x2177   :  { %v1319_v7 = vmul.f32 %v2198_v63, %v1257_v27 }
0x21d7   :  { %v1322_v42 = vpop.permute.xlu1 %1321 }
0x21d8   :  { %v1324_v43 = vmul.f32 %v2198_v63, %v1322_v42  ;;  %v1791_v42 = vld [vmem:[%s2658_s2 + $0x10] ss:$0 sm:$0xff] }
0x21da   :  { %1326 = vrot.lane.b32.xlu0 %v1324_v43, %s2283_s27 }
0x224c   :  { %v1327_v45 = vpop.permute.xlu0 %1326 }
0x224d   :  { %v1329_v46 = vadd.f32 %v1327_v45, %v1319_v7 }
0x224f   :  { %2199 = vtanh.f32 %v1329_v46 }
0x225c   :  { %v2200_v15 = vpop.eup %2199 }
0x225d   :  { %1332 = vrot.lane.b32.xlu1 %v2200_v15, %s2278_s15 }
0x22cf   :  { %v1333_v19 = vpop.permute.xlu1 %1332 }
0x22d0   :  { %v1335_v47 = vmul.f32 %v2198_v63, %v1333_v19  ;;  %v1482_v63 = vld [vmem:[%s2658_s2 + $0x20] sm:$0xff] }
0x22d2   :  { %v1336_v48 = vpack.c.bf16 %v1335_v47, %v1335_v47 }
0x22d4   :  { %1338 = vrot.lane.b32.xlu0 %v1336_v48, %s2283_s27 }
0x2346   :  { %v1339_v50 = vpop.permute.xlu0 %1338 }
0x2347   :  { %2019 = vmatmul.mubr.msk.bf16.vlgmr.msra.gmra.mxu0 %vm79_vm1, %v1339_v50 }
0x2348   :  { %2034 = vmatprep.mubr.msk.bf16.mxu0 %vm2281_vm0, %v2280_v0  ;;  %2031 = vmatpush3.bf16.msra.mxu0 %v2079_v28 }
0x2349   :  { %2032 = vmatprep.subr.bf16.mxu0 %v2280_v0 }
0x234c   :  { %2033 = vmatpush3.bf16.msra.mxu0 %v2080_v26 }
0x2407   :  { %v1377_v53 = vpop.f32.mrf.mxu0 }
0x2408   :  { %v1383_v44 = vadd.f32 %v1377_v53, %v889_v52 }
0x2409   :  { %v2020_v29 = vpop.f32.mrf.mxu0 }
0x240a   :  { %2201 = vtanh.f32 %v1383_v44  ;;  %v1788_v57 = vmul.f32 -1.442695, %v1383_v44 }
0x240b   :  { %v1380_v55 = vpop.f32.mrf.mxu0 }
0x240c   :  { %2203 = vpow2.f32 %v1788_v57 }
0x240d   :  { %v2021_v8 = vpop.f32.mrf.mxu0 }
0x2417   :  { %v2202_v56 = vpop.eup %2201 }
0x2418   :  { %1393 = vrot.lane.b32.xlu1 %v2202_v56, %s2278_s15 }
0x2419   :  { %v2204_v54 = vpop.eup %2203 }
0x241a   :  { %v1387_v58 = vadd.f32 1.0, %v2204_v54 }
0x241c   :  { %2205 = vrcp.f32 %v1387_v58 }
0x2429   :  { %v2206_v51 = vpop.eup %2205 }
0x242a   :  { %v1391_v24 = vmul.f32 %v2206_v51, %v1329_v46 }
0x248a   :  { %v1394_v59 = vpop.permute.xlu1 %1393 }
0x248b   :  { %v1396_v1 = vmul.f32 %v2206_v51, %v1394_v59 }
0x248d   :  { %1398 = vrot.lane.b32.xlu0 %v1396_v1, %s2283_s27 }
0x24ff   :  { %v1399_v49 = vpop.permute.xlu0 %1398 }
0x2500   :  { %v1401_v60 = vadd.f32 %v1399_v49, %v1391_v24 }
0x2502   :  { %2207 = vtanh.f32 %v1401_v60 }
0x250f   :  { %v2208_v61 = vpop.eup %2207 }
0x2510   :  { %1404 = vrot.lane.b32.xlu1 %v2208_v61, %s2278_s15 }
0x2582   :  { %v1405_v2 = vpop.permute.xlu1 %1404 }
0x2583   :  { %v1407_v21 = vmul.f32 %v2206_v51, %v1405_v2 }
0x2585   :  { %v1408_v5 = vpack.c.bf16 %v1407_v21, %v1407_v21 }
0x2587   :  { %1410 = vrot.lane.b32.xlu0 %v1408_v5, %s2283_s27 }
0x25f9   :  { %v1411_v6 = vpop.permute.xlu0 %1410 }
0x25fa   :  { %2027 = vmatmul.mubr.msk.bf16.vlgmr.msra.gmra.mxu1 %vm79_vm1, %v1411_v6 }
0x25fb   :  { %2054 = vmatprep.mubr.msk.bf16.mxu1 %vm2281_vm0, %v2280_v0  ;;  %2039 = vmatpush3.bf16.msra.mxu1 %v2081_v31 }
0x25fc   :  { %2040 = vmatprep.subr.bf16.mxu1 %v2280_v0 }
0x25ff   :  { %2041 = vmatpush3.bf16.msra.mxu1 %v2082_v33 }
0x2600   :  { %2042 = vmatprep.subr.bf16.mxu1 %v2280_v0 }
0x2603   :  { %2043 = vmatpush3.bf16.msra.mxu1 %v2083_v34 }
0x2604   :  { %2044 = vmatprep.subr.bf16.mxu1 %v2280_v0 }
0x2607   :  { %2045 = vmatpush3.bf16.msra.mxu1 %v2084_v37 }
0x2608   :  { %2046 = vmatprep.subr.bf16.mxu1 %v2280_v0 }
0x260b   :  { %2047 = vmatpush3.bf16.msra.mxu1 %v2085_v39 }
0x260c   :  { %2048 = vmatprep.subr.bf16.mxu1 %v2280_v0 }
0x260f   :  { %2049 = vmatpush3.bf16.msra.mxu1 %v2086_v40 }
0x2610   :  { %2050 = vmatprep.subr.bf16.mxu1 %v2280_v0 }
0x2613   :  { %2051 = vmatpush3.bf16.msra.mxu1 %v2087_v3 }
0x2614   :  { %2052 = vmatprep.subr.bf16.mxu1 %v2280_v0  ;;  %v1795_v0 = vld [vmem:[%s2658_s2 + $0x18] ss:$0 sm:$0xff]  ;;  %s2285_s2 = smov [#allocation6]  }
0x2615   :  { %s1730_s10 = sshll.u32 %s2285_s2, 4  ;;  %s1731_s10 = int_to_ptr.vmem [resolvable:$true] %s1730_s10 }
0x2616   :  { %s2253_s11 = scalar_lea.vmem %s1731_s10, 128  ;;  %p2258_p6 = scmp.lt.s32.totalorder %s1731_s10, %s1731_s10 }
0x2617   :  { %2053 = vmatpush3.bf16.msra.mxu1 %v2088_v41  ;;  %p2254_p5 = scmp.ne.s32.totalorder %s1731_s10, %s2253_s11  ;;  %p2259_p7 = scmp.lt.s32.totalorder %s2253_s11, %s2253_s11 }
0x2619   :  { %p2260_p8 = por %p2259_p7, %p2258_p6 }
0x261b   :  { %p2261_p9 = pnand %p2260_p8, %p2254_p5 }
0x26ba   :  { %v1449_v11 = vpop.f32.mrf.mxu1 }
0x26bb   :  { %v1455_v13 = vadd.f32 %v1449_v11, %v892_v10 }
0x26bc   :  { %v2028_v14 = vpop.f32.mrf.mxu1 }
0x26bd   :  { %2209 = vtanh.f32 %v1455_v13  ;;  %v1790_v20 = vmul.f32 -1.442695, %v1455_v13 }
0x26be   :  { %v1452_v16 = vpop.f32.mrf.mxu1 }
0x26bf   :  { %2211 = vpow2.f32 %v1790_v20 }
0x26c0   :  { %v2029_v17 = vpop.f32.mrf.mxu1 }
0x26ca   :  { %v2210_v18 = vpop.eup %2209 }
0x26cb   :  { %1465 = vrot.lane.b32.xlu1 %v2210_v18, %s2278_s15 }
0x26cc   :  { %v2212_v32 = vpop.eup %2211 }
0x26cd   :  { %v1459_v4 = vadd.f32 1.0, %v2212_v32 }
0x26cf   :  { %2213 = vrcp.f32 %v1459_v4 }
0x26dc   :  { %v2214_v22 = vpop.eup %2213 }
0x26dd   :  { %v1463_v9 = vmul.f32 %v2214_v22, %v1401_v60 }
0x273d   :  { %v1466_v23 = vpop.permute.xlu1 %1465 }
0x273e   :  { %v1468_v25 = vmul.f32 %v2214_v22, %v1466_v23 }
0x2740   :  { %1470 = vrot.lane.b32.xlu0 %v1468_v25, %s2283_s27 }
0x27b2   :  { %v1471_v12 = vpop.permute.xlu0 %1470 }
0x27b3   :  { %v1473_v27 = vadd.f32 %v1471_v12, %v1463_v9 }
0x27b5   :  { %2215 = vtanh.f32 %v1473_v27 }
0x27c2   :  { %v2216_v30 = vpop.eup %2215 }
0x27c3   :  { %1476 = vrot.lane.b32.xlu1 %v2216_v30, %s2278_s15 }
0x2835   :  { %v1477_v35 = vpop.permute.xlu1 %1476 }
0x2836   :  { %v1479_v36 = vmul.f32 %v2214_v22, %v1477_v35 }
0x2838   :  { %v1483_v38 = vpack.c.bf16 %v1479_v36, %v1479_v36 }
0x283a   :  { %1493 = vrot.lane.b32.xlu0 %v1483_v38, %s2283_s27 }
0x283e   :  { %1679 = vrot.lane.b32.xlu0 %v1482_v63, %s2279_s16 }
0x28ac   :  { %v1494_v62 = vpop.permute.xlu0 %1493 }
0x28ad   :  { %2035 = vmatmul.mubr.msk.bf16.vlgmr.msra.gmra.mxu0 %vm79_vm1, %v1494_v62 }
0x28b0   :  { %v1680_v57 = vpop.permute.xlu0 %1679 }
0x296d   :  { %v1544_v43 = vpop.f32.mrf.mxu0 }
0x296e   :  { %v1545_v7 = vadd.f32 %v1791_v42, %v1544_v43 }
0x296f   :  { %v2036_v45 = vpop.f32.mrf.mxu0 }
0x2970   :  { %v1550_v46 = vmax.f32 %v1545_v7, 0.0 }
0x2971   :  { %v1547_v15 = vpop.f32.mrf.mxu0 }
0x2972   :  { %v1551_v19 = vpack.c.bf16 %v1550_v46, %v1550_v46 }
0x2973   :  { %v2037_v47 = vpop.f32.mrf.mxu0 }
0x2974   :  { %2055 = vmatmul.mubr.bf16.vlgmr.msra.gmra.mxu1 %v1551_v19 }
0x2a34   :  { %v1654_v48 = vpop.f32.mrf.mxu1 }
0x2a35   :  { %v1655_v50 = vadd.f32 %v1795_v0, %v1654_v48 }
0x2a36   :  { %v2056_v52 = vpop.f32.mrf.mxu1 }
0x2a37   :  { %v1804_v53 = vmul.f32 -1.442695, %v1655_v50  ;;  %v1661_v44 = vsel %vm1660_vm2, %v1655_v50, -inf }
0x2a38   :  { %1662 = vmax.xlane.f32.xlu1 %v1661_v44  ;;  %v1657_v29 = vpop.f32.mrf.mxu1 }
0x2a39   :  { %2217 = vpow2.f32 %v1804_v53 }
0x2a3a   :  { %v2057_v55 = vpop.f32.mrf.mxu1 }
0x2a46   :  { %v2218_v8 = vpop.eup %2217 }
0x2a47   :  { %v1675_v56 = vadd.f32 1.0, %v2218_v8 }
0x2a49   :  { %2219 = vrcp.f32 %v1675_v56 }
0x2a56   :  { %v2220_v54 = vpop.eup %2219 }
0x2a57   :  { %v1682_v58 = vmul.f32 %v2220_v54, %v1680_v57  ;;  %2221 = vlog2.f32 %v2220_v54  ;;  %v1702_v20 = vmul.f32 %v2220_v54, %v2220_v54 }
0x2a59   :  { %1684 = vrot.lane.b32.xlu1 %v1682_v58, %s2284_s9 }
0x2a64   :  { %v2222_v51 = vpop.eup %2221 }
0x2a65   :  { %v1710_v59 = vmul.f32 0.6931472, %v2222_v51 }
0x2a67   :  { %1712 = vrot.lane.b32.xlu1 %v1710_v59, %s2284_s9 }
0x2ac1   :  { %v1663_v1 = vpop.xlane.xlu1 %1662 }
0x2ac2   :  { %v1664_v24 = vsub.f32 %v1655_v50, %v1663_v1 }
0x2ac4   :  { %v1665_v49 = vmul.f32 1.442695, %v1664_v24 }
0x2ac6   :  { %2223 = vpow2.f32 %v1665_v49 }
0x2acb   :  { %v1685_v6 = vpop.permute.xlu1 %1684 }
0x2ad3   :  { %v2224_v60 = vpop.eup %2223 }
0x2ad4   :  { %v1667_v61 = vsel %vm1660_vm2, %v2224_v60, 0.0 }
0x2ad5   :  { %1668 = vadd.xlane.f32.xlu0 %v1667_v61 }
0x2ad9   :  { %v1713_v26 = vpop.permute.xlu1 %1712 }
0x2b5e   :  { %v1669_v2 = vpop.xlane.xlu0 %1668 }
0x2b5f   :  { %2225 = vrcp.f32 %v1669_v2 }
0x2b6c   :  { %v2226_v21 = vpop.eup %2225 }
0x2b6d   :  { %v1671_v5 = vmul.f32 %v2226_v21, %v2224_v60 }
0x2b6f   :  { %v1687_v10 = vadd.f32 %v1685_v6, %v1671_v5 }
0x2b71   :  { %v1688_v11 = vsel %vm1660_vm2, %v1687_v10, -inf }
0x2b72   :  { %1689 = vmax.xlane.f32.xlu0 %v1688_v11 }
0x2bfb   :  { %v1690_v13 = vpop.xlane.xlu0 %1689 }
0x2bfc   :  { %v1691_v14 = vsub.f32 %v1687_v10, %v1690_v13 }
0x2bfe   :  { %v1692_v16 = vmul.f32 1.442695, %v1691_v14 }
0x2c00   :  { %2227 = vpow2.f32 %v1692_v16 }
0x2c0d   :  { %v2228_v17 = vpop.eup %2227 }
0x2c0e   :  { %v1694_v18 = vsel %vm1660_vm2, %v2228_v17, 0.0 }
0x2c0f   :  { %1695 = vadd.xlane.f32.xlu0 %v1694_v18 }
0x2c25   :  { %1704 = vrot.lane.b32.xlu0 %v1702_v20, %s2284_s9 }
0x2c98   :  { %v1696_v32 = vpop.xlane.xlu0 %1695 }
0x2c99   :  { %2229 = vrcp.f32 %v1696_v32 }
0x2c9c   :  { %v1705_v4 = vpop.permute.xlu0 %1704 }
0x2c9d   :  { %2231 = vrcp.f32 %v1705_v4 }
0x2ca6   :  { %v2230_v22 = vpop.eup %2229 }
0x2ca7   :  { %v1698_v23 = vmul.f32 %v2230_v22, %v2228_v17 }
0x2ca9   :  { %v1699_v25 = vsub.f32 %v1698_v23, %v1671_v5 }
0x2caa   :  { %v2232_v27 = vpop.eup %2231 }
0x2cab   :  { %v1700_v9 = vmul.f32 %v1699_v25, %v1699_v25 }
0x2cad   :  { %v1701_v12 = vmul.f32 -0.5, %v1700_v9 }
0x2caf   :  { %v1708_v28 = vmul.f32 %v2232_v27, %v1701_v12 }
0x2cb1   :  { %v1715_v30 = vsub.f32 %v1708_v28, %v1713_v26 }
0x2cb3   :  { %v1805_v31 = vadd.f32 -0.9189385, %v1715_v30 }
0x2cb5   :  { %1718 = vrot.lane.b32.xlu1 %v1805_v31, %s2279_s16 }
0x2d27   :  { %v1719_v33 = vpop.permute.xlu1 %1718 }
0x2d28   :  { %v1721_v34 = vsel %vm1660_vm2, %v1698_v23, %v1719_v33 }
0x2d29   :  { %1723 = vst.msk [vmem:[#allocation6] sm:$0xff] %vm1722_vm3, %v1721_v34 }
0x2d2a   :  { %2264 = shalt.err (!%p2261_p9)
}
0x2d2b   :  { %1733 = dma.vmem_to_hbm [thread:$0]  %s1731_s10, 128, %s2659_s3, [#allocation5]  }
0x2d2c   :  { %2275 = dma.done.wait [#allocation5], 128  }
0x2d2d   :  { %2276 = vsyncadd [#allocation5], 4294967168 }
0x2d2e   :  { %1737 = vsyncpa [#allocation4], 1 }
0x2d2f   :  { %1738 = vsyncpa [#allocation5], 1 }

</bundles_post_ra>
